<compile_context>
chip_gen: v5e
topology: v5e:2x2
jax: 0.10.0
libtpu: 0.0.40
codegen_flags: <defaults>
</compile_context>

<pallas_src>
import functools

import jax
import jax.numpy as jnp
import numpy as np
from jax.experimental import pallas as pl
from jax.experimental.pallas import tpu as pltpu


def faang_rnn_kernel(x_ref, slab_ref, out_ref):
    """x_ref: (T*B, I) time-major flat input; slab_ref: packed params; out_ref: (B, O)."""
    TB, I = x_ref.shape
    B, O = out_ref.shape
    T = TB // B
    G = slab_ref.shape[1]          # 8H
    H = G // 8
    H2 = 2 * H

    # Packed-slab row offsets (all multiples of 8; see prepare_params).
    R_BC = 8
    R_WC = 16
    R_WFC = 16 + H2
    R_BFC = 16 + 2 * H2

    wih1w = slab_ref[0:I, :]                # (I, 8H)  x -> layer-1 gate cols (layer-2 cols zero)
    bcomb = slab_ref[R_BC:R_BC + 1, :]      # (1, 8H)  [b1 | b2] interleaved, g pre-scaled x2
    wcomb = slab_ref[R_WC:R_WC + H2, :]     # (2H, 8H) [[Whh1, Wih2], [0, Whh2]] interleaved
    wfcw = slab_ref[R_WFC:R_WFC + H2, :]    # (2H, 8H) rows 0:H zero, rows H:2H = Wfc^T (cols >= O zero)
    bfcw = slab_ref[R_BFC:R_BFC + 1, :]     # (1, 8H)  fc bias in cols 0:O

    # Hoisted input projection for all T time steps: one MXU GEMM, summed biases
    # folded in, already in the interleaved gate-column layout.
    gadd = jnp.dot(x_ref[...], wih1w, preferred_element_type=jnp.float32) + bcomb   # (T*B, 8H)

    # Mask to keep layer-2 state at zero after the s=0 wavefront step.
    lane = jax.lax.broadcasted_iota(jnp.int32, (1, H2), 1)
    l1_mask = (lane < H).astype(jnp.float32)                                         # (1, 2H)

    hcat = jnp.zeros((B, H2), jnp.float32)   # [h1_t | h2_{t-1}]
    ccat = jnp.zeros((B, H2), jnp.float32)   # [c1_t | c2_{t-1}]

    # Wavefront recurrence, fully unrolled (T static): step s runs layer-1 time
    # step s and layer-2 time step s-1 together -> ~T+1 dependent steps total.
    for s in range(T + 1):
        # ONE fused MXU launch: h1 @ Whh1 (L1 gates) and [h1|h2] @ [Wih2;Whh2] (L2 gates).
        gc = jnp.dot(hcat, wcomb, preferred_element_type=jnp.float32)               # (B, 8H)
        add = gadd[s * B:(s + 1) * B, :] if s < T else bcomb   # last step: layer-2 only, bias term
        sig = jax.nn.sigmoid(gc + add)          # one EUP launch: i,f,o and sigmoid(2g), both layers
        ii = sig[:, 0:H2]
        ff = sig[:, H2:2 * H2]
        gg = 2.0 * sig[:, 2 * H2:3 * H2] - 1.0  # tanh(g) = 2*sigmoid(2g) - 1 (g cols pre-scaled x2)
        oo = sig[:, 3 * H2:4 * H2]
        ccat = ff * ccat + ii * gg
        hcat = oo * jnp.tanh(ccat)              # one EUP launch for both layers' cell tanh
        if s == 0:
            # Layer 2 has no time step "-1": keep its half of the state at zero.
            hcat = hcat * l1_mask
            ccat = ccat * l1_mask

    # Final Linear on the last layer-2 output.  The layer-1 half of wfcw is zero,
    # so the phantom layer-1 "step T" values contribute nothing.
    res = jnp.dot(hcat, wfcw, preferred_element_type=jnp.float32) + bfcw             # (B, 8H)
    out_ref[...] = res[:, 0:O].astype(out_ref.dtype)


def init_params(key, input_size, hidden_size, output_size):
    """Deterministic PyTorch-style uniform init (same shapes as nn.LSTM/nn.Linear)."""
    H = hidden_size
    k = 1.0 / np.sqrt(H)
    names_shapes = [
        ("w_ih_l0", (4 * H, input_size)), ("w_hh_l0", (4 * H, H)),
        ("b_ih_l0", (4 * H,)),            ("b_hh_l0", (4 * H,)),
        ("w_ih_l1", (4 * H, H)),          ("w_hh_l1", (4 * H, H)),
        ("b_ih_l1", (4 * H,)),            ("b_hh_l1", (4 * H,)),
        ("w_fc",    (output_size, H)),    ("b_fc",    (output_size,)),
    ]
    keys = jax.random.split(key, len(names_shapes))
    params = {}
    for (name, shape), kk in zip(names_shapes, keys):
        params[name] = jax.random.uniform(kk, shape, jnp.float32, -k, k)
    return params


def prepare_params(params):
    """ONE-TIME parameter preprocessing, hoisted out of the forward path.

    Builds a single packed f32 slab of shape (16 + 4H + 8, 8H) holding every
    weight/bias the kernel needs, in the fused / interleaved layout:
      * gate columns of all 8H-wide matrices: [i1 i2 | f1 f2 | g1 g2 | o1 o2]
      * g-gate weight/bias columns pre-scaled by 2 (tanh(g) = 2*sigmoid(2g)-1)
    Slab sections (sublane-aligned row offsets):
      [0 : I)            W_ih_l0^T  -> layer-1 gate columns (layer-2 cols zero)
      [8 : 9)            combined bias row [b_ih+b_hh layer1 | layer2]
      [16 : 16+2H)       W_comb = [[W_hh_l0^T, W_ih_l1^T], [0, W_hh_l1^T]]
      [16+2H : 16+4H)    fc weight: rows 0:H zero, rows H:2H = W_fc^T (cols >= O zero)
      [16+4H : 16+4H+1)  fc bias in cols 0:O
    """
    H = params["w_hh_l0"].shape[1]
    I = params["w_ih_l0"].shape[1]
    O = params["w_fc"].shape[0]
    G = 8 * H

    wih1 = params["w_ih_l0"].T.astype(jnp.float32)   # (I, 4H), gate cols [i f g o]
    whh1 = params["w_hh_l0"].T.astype(jnp.float32)   # (H, 4H)
    wih2 = params["w_ih_l1"].T.astype(jnp.float32)   # (H, 4H)
    whh2 = params["w_hh_l1"].T.astype(jnp.float32)   # (H, 4H)
    b1 = (params["b_ih_l0"] + params["b_hh_l0"])[None, :].astype(jnp.float32)   # (1, 4H)
    b2 = (params["b_ih_l1"] + params["b_hh_l1"])[None, :].astype(jnp.float32)   # (1, 4H)
    wfc = params["w_fc"].T.astype(jnp.float32)       # (H, O)
    bfc = params["b_fc"].astype(jnp.float32)         # (O,)

    def gate_blocks(w):
        # Split (rows, 4H) into [i, f, g, o] blocks, pre-scaling g by 2.
        blk = [w[:, k * H:(k + 1) * H] for k in range(4)]
        blk[2] = 2.0 * blk[2]
        return blk

    def interleave(l1_blocks, l2_blocks):
        # -> (rows, 8H) with column layout [i1 i2 | f1 f2 | g1 g2 | o1 o2]
        cols = []
        for k in range(4):
            cols += [l1_blocks[k], l2_blocks[k]]
        return jnp.concatenate(cols, axis=1)

    zI = [jnp.zeros((I, H), jnp.float32)] * 4
    zH = [jnp.zeros((H, H), jnp.float32)] * 4

    wih1_wide = interleave(gate_blocks(wih1), zI)                       # (I, 8H)
    w_top = interleave(gate_blocks(whh1), gate_blocks(wih2))            # (H, 8H)
    w_bot = interleave(zH, gate_blocks(whh2))                           # (H, 8H)
    w_comb = jnp.concatenate([w_top, w_bot], axis=0)                    # (2H, 8H)
    bcomb = interleave(gate_blocks(b1), gate_blocks(b2))                # (1, 8H)

    wfc_wide = jnp.zeros((2 * H, G), jnp.float32).at[H:, :O].set(wfc)   # (2H, 8H)
    bfc_wide = jnp.zeros((1, G), jnp.float32).at[0, :O].set(bfc)        # (1, 8H)

    R_BC, R_WC = 8, 16
    R_WFC, R_BFC = 16 + 2 * H, 16 + 4 * H
    n_rows = R_BFC + 8
    slab = jnp.zeros((n_rows, G), jnp.float32)
    slab = slab.at[0:I, :].set(wih1_wide)
    slab = slab.at[R_BC:R_BC + 1, :].set(bcomb)
    slab = slab.at[R_WC:R_WC + 2 * H, :].set(w_comb)
    slab = slab.at[R_WFC:R_WFC + 2 * H, :].set(wfc_wide)
    slab = slab.at[R_BFC:R_BFC + 1, :].set(bfc_wide)
    return slab, O


def faang_rnn_forward(x, slab, output_size):
    """x: (B, T, input_size) f32, batch_first like the PyTorch module.
    slab: packed params from prepare_params (one-time)."""
    B, T, I = x.shape
    # Only per-call prep: time-major flat layout for the hoisted input GEMM.
    x_flat = jnp.transpose(x, (1, 0, 2)).reshape(T * B, I)

    vmem = pl.BlockSpec(memory_space=pltpu.MemorySpace.VMEM)
    # Single untiled VMEM-resident call (latency-bound, ~170 KB footprint):
    # no grid / no tiling, single TensorCore — B=2 is too small for megacore.
    return pl.pallas_call(
        faang_rnn_kernel,
        out_shape=jax.ShapeDtypeStruct((B, output_size), jnp.float32),
        in_specs=[vmem, vmem],
        out_specs=vmem,
    )(x_flat, slab)


def faang_rnn_reference(x, params):
    """Pure-JAX reference matching PyTorch nn.LSTM (eval) + nn.Linear."""
    B, T, I = x.shape
    H = params["w_hh_l0"].shape[1]

    def cell(xt, h, c, w_ih, w_hh, b_ih, b_hh):
        gates = xt @ w_ih.T + b_ih + h @ w_hh.T + b_hh
        i, f, g, o = jnp.split(gates, 4, axis=-1)
        c_new = jax.nn.sigmoid(f) * c + jax.nn.sigmoid(i) * jnp.tanh(g)
        h_new = jax.nn.sigmoid(o) * jnp.tanh(c_new)
        return h_new, c_new

    h1 = c1 = h2 = c2 = jnp.zeros((B, H), jnp.float32)
    for t in range(T):
        h1, c1 = cell(x[:, t, :], h1, c1,
                      params["w_ih_l0"], params["w_hh_l0"],
                      params["b_ih_l0"], params["b_hh_l0"])
        h2, c2 = cell(h1, h2, c2,
                      params["w_ih_l1"], params["w_hh_l1"],
                      params["b_ih_l1"], params["b_hh_l1"])
    return h2 @ params["w_fc"].T + params["b_fc"]


if __name__ == "__main__":
    batch, seq, input_size, hidden_size, output_size = 2, 8, 4, 32, 8

    key = jax.random.PRNGKey(0)
    kx, kp = jax.random.split(key)
    x = jax.random.normal(kx, (batch, seq, input_size), jnp.float32)
    params = init_params(kp, input_size, hidden_size, output_size)

    # One-time parameter preparation (hoisted out of the forward path).
    slab, out_dim = prepare_params(params)
    slab = jax.block_until_ready(slab)

    fwd = jax.jit(functools.partial(faang_rnn_forward, output_size=out_dim))
    out = jax.block_until_ready(fwd(x, slab))

    ref = faang_rnn_reference(x, params)
    np.testing.assert_allclose(np.asarray(out), np.asarray(ref),
                               rtol=1e-4, atol=1e-4)
    print("KERNEL_OK")
</pallas_src>

<mosaic_0001>
module attributes {stable_mosaic.version = 11 : i64} {
  func.func @faang_rnn_kernel(%arg0: memref<16x4xf32, #tpu.memory_space<vmem>>, %arg1: memref<152x256xf32, #tpu.memory_space<vmem>>, %arg2: memref<2x8xf32, #tpu.memory_space<vmem>>) attributes {dimension_semantics = [], scalar_prefetch = 0 : i64, scratch_operands = 0 : i64, tpu.core_type = #tpu.core_type<tc>} {
    %c0 = arith.constant 0 : index
    %c0_0 = arith.constant 0 : index
    %0 = vector.load %arg1[%c0, %c0_0] : memref<152x256xf32, #tpu.memory_space<vmem>>, vector<4x256xf32>
    %c8 = arith.constant 8 : index
    %c0_1 = arith.constant 0 : index
    %1 = vector.load %arg1[%c8, %c0_1] : memref<152x256xf32, #tpu.memory_space<vmem>>, vector<1x256xf32>
    %c16 = arith.constant 16 : index
    %c0_2 = arith.constant 0 : index
    %2 = vector.load %arg1[%c16, %c0_2] : memref<152x256xf32, #tpu.memory_space<vmem>>, vector<64x256xf32>
    %c80 = arith.constant 80 : index
    %c0_3 = arith.constant 0 : index
    %3 = vector.load %arg1[%c80, %c0_3] : memref<152x256xf32, #tpu.memory_space<vmem>>, vector<64x256xf32>
    %c144 = arith.constant 144 : index
    %c0_4 = arith.constant 0 : index
    %4 = vector.load %arg1[%c144, %c0_4] : memref<152x256xf32, #tpu.memory_space<vmem>>, vector<1x256xf32>
    %c0_5 = arith.constant 0 : index
    %c0_6 = arith.constant 0 : index
    %5 = vector.load %arg0[%c0_5, %c0_6] : memref<16x4xf32, #tpu.memory_space<vmem>>, vector<16x4xf32>
    %cst = arith.constant dense<0.000000e+00> : vector<16x256xf32>
    %6 = tpu.matmul %5, %0, %cst {dimension_numbers = #tpu.dot_dimension_numbers<[1], [0], [0], [1], [0, 0, 1, 1], [], []>} : vector<16x4xf32>, vector<4x256xf32>, vector<16x256xf32> -> vector<16x256xf32>
    %7 = vector.broadcast %1 : vector<1x256xf32> to vector<16x256xf32>
    %8 = arith.addf %6, %7 : vector<16x256xf32>
    %9 = tpu.iota {dimensions = array<i32: 1>} : vector<1x64xi32>
    %c32_i32 = arith.constant 32 : i32
    %10 = vector.broadcast %c32_i32 : i32 to vector<1x64xi32>
    %11 = arith.cmpi slt, %9, %10 : vector<1x64xi32>
    %12 = arith.extui %11 : vector<1x64xi1> to vector<1x64xi32>
    %13 = arith.sitofp %12 : vector<1x64xi32> to vector<1x64xf32>
    %cst_7 = arith.constant 0.000000e+00 : f32
    %14 = vector.broadcast %cst_7 : f32 to vector<2x64xf32>
    %cst_8 = arith.constant 0.000000e+00 : f32
    %15 = vector.broadcast %cst_8 : f32 to vector<2x64xf32>
    %cst_9 = arith.constant dense<0.000000e+00> : vector<2x256xf32>
    %16 = tpu.matmul %14, %2, %cst_9 {dimension_numbers = #tpu.dot_dimension_numbers<[1], [0], [0], [1], [0, 0, 1, 1], [], []>} : vector<2x64xf32>, vector<64x256xf32>, vector<2x256xf32> -> vector<2x256xf32>
    %17 = vector.extract_strided_slice %8 {offsets = [0, 0], sizes = [2, 256], strides = [1, 1]} : vector<16x256xf32> to vector<2x256xf32>
    %18 = arith.addf %16, %17 : vector<2x256xf32>
    %19 = arith.negf %18 : vector<2x256xf32>
    %20 = math.exp %19 : vector<2x256xf32>
    %cst_10 = arith.constant 1.000000e+00 : f32
    %21 = vector.broadcast %cst_10 : f32 to vector<2x256xf32>
    %22 = arith.addf %21, %20 : vector<2x256xf32>
    %23 = arith.divf %21, %22 : vector<2x256xf32>
    %24 = vector.extract_strided_slice %23 {offsets = [0, 0], sizes = [2, 64], strides = [1, 1]} : vector<2x256xf32> to vector<2x64xf32>
    %25 = vector.extract_strided_slice %23 {offsets = [0, 64], sizes = [2, 64], strides = [1, 1]} : vector<2x256xf32> to vector<2x64xf32>
    %26 = vector.extract_strided_slice %23 {offsets = [0, 128], sizes = [2, 64], strides = [1, 1]} : vector<2x256xf32> to vector<2x64xf32>
    %cst_11 = arith.constant 2.000000e+00 : f32
    %27 = vector.broadcast %cst_11 : f32 to vector<2x64xf32>
    %28 = arith.mulf %27, %26 : vector<2x64xf32>
    %cst_12 = arith.constant 1.000000e+00 : f32
    %29 = vector.broadcast %cst_12 : f32 to vector<2x64xf32>
    %30 = arith.subf %28, %29 : vector<2x64xf32>
    %31 = vector.extract_strided_slice %23 {offsets = [0, 192], sizes = [2, 64], strides = [1, 1]} : vector<2x256xf32> to vector<2x64xf32>
    %32 = arith.mulf %25, %15 : vector<2x64xf32>
    %33 = arith.mulf %24, %30 : vector<2x64xf32>
    %34 = arith.addf %32, %33 : vector<2x64xf32>
    %35 = math.tanh %34 : vector<2x64xf32>
    %36 = arith.mulf %31, %35 : vector<2x64xf32>
    %37 = vector.broadcast %13 : vector<1x64xf32> to vector<2x64xf32>
    %38 = arith.mulf %36, %37 : vector<2x64xf32>
    %39 = vector.broadcast %13 : vector<1x64xf32> to vector<2x64xf32>
    %40 = arith.mulf %34, %39 : vector<2x64xf32>
    %cst_13 = arith.constant dense<0.000000e+00> : vector<2x256xf32>
    %41 = tpu.matmul %38, %2, %cst_13 {dimension_numbers = #tpu.dot_dimension_numbers<[1], [0], [0], [1], [0, 0, 1, 1], [], []>} : vector<2x64xf32>, vector<64x256xf32>, vector<2x256xf32> -> vector<2x256xf32>
    %42 = vector.extract_strided_slice %8 {offsets = [2, 0], sizes = [2, 256], strides = [1, 1]} : vector<16x256xf32> to vector<2x256xf32>
    %43 = arith.addf %41, %42 : vector<2x256xf32>
    %44 = arith.negf %43 : vector<2x256xf32>
    %45 = math.exp %44 : vector<2x256xf32>
    %cst_14 = arith.constant 1.000000e+00 : f32
    %46 = vector.broadcast %cst_14 : f32 to vector<2x256xf32>
    %47 = arith.addf %46, %45 : vector<2x256xf32>
    %48 = arith.divf %46, %47 : vector<2x256xf32>
    %49 = vector.extract_strided_slice %48 {offsets = [0, 0], sizes = [2, 64], strides = [1, 1]} : vector<2x256xf32> to vector<2x64xf32>
    %50 = vector.extract_strided_slice %48 {offsets = [0, 64], sizes = [2, 64], strides = [1, 1]} : vector<2x256xf32> to vector<2x64xf32>
    %51 = vector.extract_strided_slice %48 {offsets = [0, 128], sizes = [2, 64], strides = [1, 1]} : vector<2x256xf32> to vector<2x64xf32>
    %cst_15 = arith.constant 2.000000e+00 : f32
    %52 = vector.broadcast %cst_15 : f32 to vector<2x64xf32>
    %53 = arith.mulf %52, %51 : vector<2x64xf32>
    %cst_16 = arith.constant 1.000000e+00 : f32
    %54 = vector.broadcast %cst_16 : f32 to vector<2x64xf32>
    %55 = arith.subf %53, %54 : vector<2x64xf32>
    %56 = vector.extract_strided_slice %48 {offsets = [0, 192], sizes = [2, 64], strides = [1, 1]} : vector<2x256xf32> to vector<2x64xf32>
    %57 = arith.mulf %50, %40 : vector<2x64xf32>
    %58 = arith.mulf %49, %55 : vector<2x64xf32>
    %59 = arith.addf %57, %58 : vector<2x64xf32>
    %60 = math.tanh %59 : vector<2x64xf32>
    %61 = arith.mulf %56, %60 : vector<2x64xf32>
    %cst_17 = arith.constant dense<0.000000e+00> : vector<2x256xf32>
    %62 = tpu.matmul %61, %2, %cst_17 {dimension_numbers = #tpu.dot_dimension_numbers<[1], [0], [0], [1], [0, 0, 1, 1], [], []>} : vector<2x64xf32>, vector<64x256xf32>, vector<2x256xf32> -> vector<2x256xf32>
    %63 = vector.extract_strided_slice %8 {offsets = [4, 0], sizes = [2, 256], strides = [1, 1]} : vector<16x256xf32> to vector<2x256xf32>
    %64 = arith.addf %62, %63 : vector<2x256xf32>
    %65 = arith.negf %64 : vector<2x256xf32>
    %66 = math.exp %65 : vector<2x256xf32>
    %cst_18 = arith.constant 1.000000e+00 : f32
    %67 = vector.broadcast %cst_18 : f32 to vector<2x256xf32>
    %68 = arith.addf %67, %66 : vector<2x256xf32>
    %69 = arith.divf %67, %68 : vector<2x256xf32>
    %70 = vector.extract_strided_slice %69 {offsets = [0, 0], sizes = [2, 64], strides = [1, 1]} : vector<2x256xf32> to vector<2x64xf32>
    %71 = vector.extract_strided_slice %69 {offsets = [0, 64], sizes = [2, 64], strides = [1, 1]} : vector<2x256xf32> to vector<2x64xf32>
    %72 = vector.extract_strided_slice %69 {offsets = [0, 128], sizes = [2, 64], strides = [1, 1]} : vector<2x256xf32> to vector<2x64xf32>
    %cst_19 = arith.constant 2.000000e+00 : f32
    %73 = vector.broadcast %cst_19 : f32 to vector<2x64xf32>
    %74 = arith.mulf %73, %72 : vector<2x64xf32>
    %cst_20 = arith.constant 1.000000e+00 : f32
    %75 = vector.broadcast %cst_20 : f32 to vector<2x64xf32>
    %76 = arith.subf %74, %75 : vector<2x64xf32>
    %77 = vector.extract_strided_slice %69 {offsets = [0, 192], sizes = [2, 64], strides = [1, 1]} : vector<2x256xf32> to vector<2x64xf32>
    %78 = arith.mulf %71, %59 : vector<2x64xf32>
    %79 = arith.mulf %70, %76 : vector<2x64xf32>
    %80 = arith.addf %78, %79 : vector<2x64xf32>
    %81 = math.tanh %80 : vector<2x64xf32>
    %82 = arith.mulf %77, %81 : vector<2x64xf32>
    %cst_21 = arith.constant dense<0.000000e+00> : vector<2x256xf32>
    %83 = tpu.matmul %82, %2, %cst_21 {dimension_numbers = #tpu.dot_dimension_numbers<[1], [0], [0], [1], [0, 0, 1, 1], [], []>} : vector<2x64xf32>, vector<64x256xf32>, vector<2x256xf32> -> vector<2x256xf32>
    %84 = vector.extract_strided_slice %8 {offsets = [6, 0], sizes = [2, 256], strides = [1, 1]} : vector<16x256xf32> to vector<2x256xf32>
    %85 = arith.addf %83, %84 : vector<2x256xf32>
    %86 = arith.negf %85 : vector<2x256xf32>
    %87 = math.exp %86 : vector<2x256xf32>
    %cst_22 = arith.constant 1.000000e+00 : f32
    %88 = vector.broadcast %cst_22 : f32 to vector<2x256xf32>
    %89 = arith.addf %88, %87 : vector<2x256xf32>
    %90 = arith.divf %88, %89 : vector<2x256xf32>
    %91 = vector.extract_strided_slice %90 {offsets = [0, 0], sizes = [2, 64], strides = [1, 1]} : vector<2x256xf32> to vector<2x64xf32>
    %92 = vector.extract_strided_slice %90 {offsets = [0, 64], sizes = [2, 64], strides = [1, 1]} : vector<2x256xf32> to vector<2x64xf32>
    %93 = vector.extract_strided_slice %90 {offsets = [0, 128], sizes = [2, 64], strides = [1, 1]} : vector<2x256xf32> to vector<2x64xf32>
    %cst_23 = arith.constant 2.000000e+00 : f32
    %94 = vector.broadcast %cst_23 : f32 to vector<2x64xf32>
    %95 = arith.mulf %94, %93 : vector<2x64xf32>
    %cst_24 = arith.constant 1.000000e+00 : f32
    %96 = vector.broadcast %cst_24 : f32 to vector<2x64xf32>
    %97 = arith.subf %95, %96 : vector<2x64xf32>
    %98 = vector.extract_strided_slice %90 {offsets = [0, 192], sizes = [2, 64], strides = [1, 1]} : vector<2x256xf32> to vector<2x64xf32>
    %99 = arith.mulf %92, %80 : vector<2x64xf32>
    %100 = arith.mulf %91, %97 : vector<2x64xf32>
    %101 = arith.addf %99, %100 : vector<2x64xf32>
    %102 = math.tanh %101 : vector<2x64xf32>
    %103 = arith.mulf %98, %102 : vector<2x64xf32>
    %cst_25 = arith.constant dense<0.000000e+00> : vector<2x256xf32>
    %104 = tpu.matmul %103, %2, %cst_25 {dimension_numbers = #tpu.dot_dimension_numbers<[1], [0], [0], [1], [0, 0, 1, 1], [], []>} : vector<2x64xf32>, vector<64x256xf32>, vector<2x256xf32> -> vector<2x256xf32>
    %105 = vector.extract_strided_slice %8 {offsets = [8, 0], sizes = [2, 256], strides = [1, 1]} : vector<16x256xf32> to vector<2x256xf32>
    %106 = arith.addf %104, %105 : vector<2x256xf32>
    %107 = arith.negf %106 : vector<2x256xf32>
    %108 = math.exp %107 : vector<2x256xf32>
    %cst_26 = arith.constant 1.000000e+00 : f32
    %109 = vector.broadcast %cst_26 : f32 to vector<2x256xf32>
    %110 = arith.addf %109, %108 : vector<2x256xf32>
    %111 = arith.divf %109, %110 : vector<2x256xf32>
    %112 = vector.extract_strided_slice %111 {offsets = [0, 0], sizes = [2, 64], strides = [1, 1]} : vector<2x256xf32> to vector<2x64xf32>
    %113 = vector.extract_strided_slice %111 {offsets = [0, 64], sizes = [2, 64], strides = [1, 1]} : vector<2x256xf32> to vector<2x64xf32>
    %114 = vector.extract_strided_slice %111 {offsets = [0, 128], sizes = [2, 64], strides = [1, 1]} : vector<2x256xf32> to vector<2x64xf32>
    %cst_27 = arith.constant 2.000000e+00 : f32
    %115 = vector.broadcast %cst_27 : f32 to vector<2x64xf32>
    %116 = arith.mulf %115, %114 : vector<2x64xf32>
    %cst_28 = arith.constant 1.000000e+00 : f32
    %117 = vector.broadcast %cst_28 : f32 to vector<2x64xf32>
    %118 = arith.subf %116, %117 : vector<2x64xf32>
    %119 = vector.extract_strided_slice %111 {offsets = [0, 192], sizes = [2, 64], strides = [1, 1]} : vector<2x256xf32> to vector<2x64xf32>
    %120 = arith.mulf %113, %101 : vector<2x64xf32>
    %121 = arith.mulf %112, %118 : vector<2x64xf32>
    %122 = arith.addf %120, %121 : vector<2x64xf32>
    %123 = math.tanh %122 : vector<2x64xf32>
    %124 = arith.mulf %119, %123 : vector<2x64xf32>
    %cst_29 = arith.constant dense<0.000000e+00> : vector<2x256xf32>
    %125 = tpu.matmul %124, %2, %cst_29 {dimension_numbers = #tpu.dot_dimension_numbers<[1], [0], [0], [1], [0, 0, 1, 1], [], []>} : vector<2x64xf32>, vector<64x256xf32>, vector<2x256xf32> -> vector<2x256xf32>
    %126 = vector.extract_strided_slice %8 {offsets = [10, 0], sizes = [2, 256], strides = [1, 1]} : vector<16x256xf32> to vector<2x256xf32>
    %127 = arith.addf %125, %126 : vector<2x256xf32>
    %128 = arith.negf %127 : vector<2x256xf32>
    %129 = math.exp %128 : vector<2x256xf32>
    %cst_30 = arith.constant 1.000000e+00 : f32
    %130 = vector.broadcast %cst_30 : f32 to vector<2x256xf32>
    %131 = arith.addf %130, %129 : vector<2x256xf32>
    %132 = arith.divf %130, %131 : vector<2x256xf32>
    %133 = vector.extract_strided_slice %132 {offsets = [0, 0], sizes = [2, 64], strides = [1, 1]} : vector<2x256xf32> to vector<2x64xf32>
    %134 = vector.extract_strided_slice %132 {offsets = [0, 64], sizes = [2, 64], strides = [1, 1]} : vector<2x256xf32> to vector<2x64xf32>
    %135 = vector.extract_strided_slice %132 {offsets = [0, 128], sizes = [2, 64], strides = [1, 1]} : vector<2x256xf32> to vector<2x64xf32>
    %cst_31 = arith.constant 2.000000e+00 : f32
    %136 = vector.broadcast %cst_31 : f32 to vector<2x64xf32>
    %137 = arith.mulf %136, %135 : vector<2x64xf32>
    %cst_32 = arith.constant 1.000000e+00 : f32
    %138 = vector.broadcast %cst_32 : f32 to vector<2x64xf32>
    %139 = arith.subf %137, %138 : vector<2x64xf32>
    %140 = vector.extract_strided_slice %132 {offsets = [0, 192], sizes = [2, 64], strides = [1, 1]} : vector<2x256xf32> to vector<2x64xf32>
    %141 = arith.mulf %134, %122 : vector<2x64xf32>
    %142 = arith.mulf %133, %139 : vector<2x64xf32>
    %143 = arith.addf %141, %142 : vector<2x64xf32>
    %144 = math.tanh %143 : vector<2x64xf32>
    %145 = arith.mulf %140, %144 : vector<2x64xf32>
    %cst_33 = arith.constant dense<0.000000e+00> : vector<2x256xf32>
    %146 = tpu.matmul %145, %2, %cst_33 {dimension_numbers = #tpu.dot_dimension_numbers<[1], [0], [0], [1], [0, 0, 1, 1], [], []>} : vector<2x64xf32>, vector<64x256xf32>, vector<2x256xf32> -> vector<2x256xf32>
    %147 = vector.extract_strided_slice %8 {offsets = [12, 0], sizes = [2, 256], strides = [1, 1]} : vector<16x256xf32> to vector<2x256xf32>
    %148 = arith.addf %146, %147 : vector<2x256xf32>
    %149 = arith.negf %148 : vector<2x256xf32>
    %150 = math.exp %149 : vector<2x256xf32>
    %cst_34 = arith.constant 1.000000e+00 : f32
    %151 = vector.broadcast %cst_34 : f32 to vector<2x256xf32>
    %152 = arith.addf %151, %150 : vector<2x256xf32>
    %153 = arith.divf %151, %152 : vector<2x256xf32>
    %154 = vector.extract_strided_slice %153 {offsets = [0, 0], sizes = [2, 64], strides = [1, 1]} : vector<2x256xf32> to vector<2x64xf32>
    %155 = vector.extract_strided_slice %153 {offsets = [0, 64], sizes = [2, 64], strides = [1, 1]} : vector<2x256xf32> to vector<2x64xf32>
    %156 = vector.extract_strided_slice %153 {offsets = [0, 128], sizes = [2, 64], strides = [1, 1]} : vector<2x256xf32> to vector<2x64xf32>
    %cst_35 = arith.constant 2.000000e+00 : f32
    %157 = vector.broadcast %cst_35 : f32 to vector<2x64xf32>
    %158 = arith.mulf %157, %156 : vector<2x64xf32>
    %cst_36 = arith.constant 1.000000e+00 : f32
    %159 = vector.broadcast %cst_36 : f32 to vector<2x64xf32>
    %160 = arith.subf %158, %159 : vector<2x64xf32>
    %161 = vector.extract_strided_slice %153 {offsets = [0, 192], sizes = [2, 64], strides = [1, 1]} : vector<2x256xf32> to vector<2x64xf32>
    %162 = arith.mulf %155, %143 : vector<2x64xf32>
    %163 = arith.mulf %154, %160 : vector<2x64xf32>
    %164 = arith.addf %162, %163 : vector<2x64xf32>
    %165 = math.tanh %164 : vector<2x64xf32>
    %166 = arith.mulf %161, %165 : vector<2x64xf32>
    %cst_37 = arith.constant dense<0.000000e+00> : vector<2x256xf32>
    %167 = tpu.matmul %166, %2, %cst_37 {dimension_numbers = #tpu.dot_dimension_numbers<[1], [0], [0], [1], [0, 0, 1, 1], [], []>} : vector<2x64xf32>, vector<64x256xf32>, vector<2x256xf32> -> vector<2x256xf32>
    %168 = vector.extract_strided_slice %8 {offsets = [14, 0], sizes = [2, 256], strides = [1, 1]} : vector<16x256xf32> to vector<2x256xf32>
    %169 = arith.addf %167, %168 : vector<2x256xf32>
    %170 = arith.negf %169 : vector<2x256xf32>
    %171 = math.exp %170 : vector<2x256xf32>
    %cst_38 = arith.constant 1.000000e+00 : f32
    %172 = vector.broadcast %cst_38 : f32 to vector<2x256xf32>
    %173 = arith.addf %172, %171 : vector<2x256xf32>
    %174 = arith.divf %172, %173 : vector<2x256xf32>
    %175 = vector.extract_strided_slice %174 {offsets = [0, 0], sizes = [2, 64], strides = [1, 1]} : vector<2x256xf32> to vector<2x64xf32>
    %176 = vector.extract_strided_slice %174 {offsets = [0, 64], sizes = [2, 64], strides = [1, 1]} : vector<2x256xf32> to vector<2x64xf32>
    %177 = vector.extract_strided_slice %174 {offsets = [0, 128], sizes = [2, 64], strides = [1, 1]} : vector<2x256xf32> to vector<2x64xf32>
    %cst_39 = arith.constant 2.000000e+00 : f32
    %178 = vector.broadcast %cst_39 : f32 to vector<2x64xf32>
    %179 = arith.mulf %178, %177 : vector<2x64xf32>
    %cst_40 = arith.constant 1.000000e+00 : f32
    %180 = vector.broadcast %cst_40 : f32 to vector<2x64xf32>
    %181 = arith.subf %179, %180 : vector<2x64xf32>
    %182 = vector.extract_strided_slice %174 {offsets = [0, 192], sizes = [2, 64], strides = [1, 1]} : vector<2x256xf32> to vector<2x64xf32>
    %183 = arith.mulf %176, %164 : vector<2x64xf32>
    %184 = arith.mulf %175, %181 : vector<2x64xf32>
    %185 = arith.addf %183, %184 : vector<2x64xf32>
    %186 = math.tanh %185 : vector<2x64xf32>
    %187 = arith.mulf %182, %186 : vector<2x64xf32>
    %cst_41 = arith.constant dense<0.000000e+00> : vector<2x256xf32>
    %188 = tpu.matmul %187, %2, %cst_41 {dimension_numbers = #tpu.dot_dimension_numbers<[1], [0], [0], [1], [0, 0, 1, 1], [], []>} : vector<2x64xf32>, vector<64x256xf32>, vector<2x256xf32> -> vector<2x256xf32>
    %189 = vector.broadcast %1 : vector<1x256xf32> to vector<2x256xf32>
    %190 = arith.addf %188, %189 : vector<2x256xf32>
    %191 = arith.negf %190 : vector<2x256xf32>
    %192 = math.exp %191 : vector<2x256xf32>
    %cst_42 = arith.constant 1.000000e+00 : f32
    %193 = vector.broadcast %cst_42 : f32 to vector<2x256xf32>
    %194 = arith.addf %193, %192 : vector<2x256xf32>
    %195 = arith.divf %193, %194 : vector<2x256xf32>
    %196 = vector.extract_strided_slice %195 {offsets = [0, 0], sizes = [2, 64], strides = [1, 1]} : vector<2x256xf32> to vector<2x64xf32>
    %197 = vector.extract_strided_slice %195 {offsets = [0, 64], sizes = [2, 64], strides = [1, 1]} : vector<2x256xf32> to vector<2x64xf32>
    %198 = vector.extract_strided_slice %195 {offsets = [0, 128], sizes = [2, 64], strides = [1, 1]} : vector<2x256xf32> to vector<2x64xf32>
    %cst_43 = arith.constant 2.000000e+00 : f32
    %199 = vector.broadcast %cst_43 : f32 to vector<2x64xf32>
    %200 = arith.mulf %199, %198 : vector<2x64xf32>
    %cst_44 = arith.constant 1.000000e+00 : f32
    %201 = vector.broadcast %cst_44 : f32 to vector<2x64xf32>
    %202 = arith.subf %200, %201 : vector<2x64xf32>
    %203 = vector.extract_strided_slice %195 {offsets = [0, 192], sizes = [2, 64], strides = [1, 1]} : vector<2x256xf32> to vector<2x64xf32>
    %204 = arith.mulf %197, %185 : vector<2x64xf32>
    %205 = arith.mulf %196, %202 : vector<2x64xf32>
    %206 = arith.addf %204, %205 : vector<2x64xf32>
    %207 = math.tanh %206 : vector<2x64xf32>
    %208 = arith.mulf %203, %207 : vector<2x64xf32>
    %cst_45 = arith.constant dense<0.000000e+00> : vector<2x256xf32>
    %209 = tpu.matmul %208, %3, %cst_45 {dimension_numbers = #tpu.dot_dimension_numbers<[1], [0], [0], [1], [0, 0, 1, 1], [], []>} : vector<2x64xf32>, vector<64x256xf32>, vector<2x256xf32> -> vector<2x256xf32>
    %210 = vector.broadcast %4 : vector<1x256xf32> to vector<2x256xf32>
    %211 = arith.addf %209, %210 : vector<2x256xf32>
    %212 = vector.extract_strided_slice %211 {offsets = [0, 0], sizes = [2, 8], strides = [1, 1]} : vector<2x256xf32> to vector<2x8xf32>
    %c0_46 = arith.constant 0 : index
    %c0_47 = arith.constant 0 : index
    %213 = vector.load %arg2[%c0_46, %c0_47] : memref<2x8xf32, #tpu.memory_space<vmem>>, vector<2x8xf32>
    tpu.vector_store %arg2[%c0_46, %c0_47], %212 {strides = array<i32>} : memref<2x8xf32, #tpu.memory_space<vmem>>, vector<2x8xf32>,
    return
  }
}

</mosaic_0001>

<bundles_post_ra>
// kernel: faang_rnn_forward.1
= control target key start
LH: loop header
LB: loop body
LE: loop exit
PB: predicated region body
PF: predicated region fallthrough
CT: control target
= control target key end

     0   :  { %7 = vsyncpa [#allocation3], 0  ;;  %s1567_s0 = inlined_call_operand.vmem [shape: f32[16,4], index: 0, kind: input, shape index: {}]   ;;  %s1568_s1 = inlined_call_operand.hbm [shape: f32[152,256], index: 1, kind: input, shape index: {}]   ;;  %s1569_s2 = inlined_call_operand.hbm [shape: f32[2,8], index: 2, kind: output, shape index: {}]  }
   0x1   :  { %8 = vsyncpa [#allocation4], 0  ;;  %s15_s11 = sshll.u32 %s1568_s1, 4  ;;  %s1255_s12 = smov [#allocation2]   ;;  %s16_s11 = int_to_ptr.hbm [resolvable:$true] %s15_s11 }
   0x2   :  { %s17_s13 = sshll.u32 %s1255_s12, 4  ;;  %s1256_s14 = smov 256   ;;  %s18_s13 = int_to_ptr.vmem [resolvable:$true] %s17_s13 }
   0x3   :  { %s1257_s15 = smov 16  }
   0x4   :  { %23 = dma.hbm_to_vmem [thread:$0]  %s16_s11, 4864, %s18_s13, [#allocation3], %s1256_s14, %s1256_s14, %s1257_s15  }
   0x5   :  { %1251 = dma.done.wait [#allocation3], 4864  }
   0x6   :  { %1252 = vsyncadd [#allocation3], 4294962432  ;;  %v1279_v0 = vld [vmem:[#allocation2 + $0x90] sm:$0xff]  ;;  %v1281_v1 = vld [vmem:[#allocation2 + $0x98] sm:$0xff]  ;;  %vm72_vm0 = vcmask 1043456   ;;  %vm65_vm1 = vcmask 31744   ;;  %v125_v56 = vlaneseq }
   0x7   :  { %v1283_v2 = vld [vmem:[#allocation2 + $0x80] sm:$0xff]  ;;  %142 = vmatpush.msra.mxu2 %v1279_v0  ;;  %162 = vmatpush.msra.mxu3 %v1281_v1  ;;  %v1287_v3 = vld [vmem:[#allocation2 + $0x88] sm:$0xff]  ;;  %v1289_v4 = vld [vmem:[#allocation2 + $0x70] sm:$0xff]  ;;  %v1258_v19 = vmov 0.0   ;;  %s1259_s17 = smov 64   ;;  %vm130_vm11 = vcmask 523264  }
   0x8   :  { %v1291_v5 = vld [vmem:[#allocation2 + $0x78] sm:$0xff]  ;;  %v1295_v6 = vld [vmem:[#allocation2 + $0x60] sm:$0xff]  ;;  %v1297_v7 = vld [vmem:[#allocation2 + $0x68] sm:$0xff]  ;;  %v126_v61 = vand.u32 127, %v125_v56  ;;  %s1046_s23 = sshll.u32 %s1569_s2, 4  ;;  %s1047_s23 = int_to_ptr.hbm [resolvable:$true] %s1046_s23 }
   0x9   :  { %143 = vmatpush.msra.mxu2 %v1283_v2  ;;  %163 = vmatpush.msra.mxu3 %v1287_v3  ;;  %v28_v8 = vld [vmem:[#allocation2] sm:$0xf]  ;;  %v29_v9 = vld [vmem:[#allocation2 + $0x8] sm:$0xf]  ;;  %v1301_v10 = vld [vmem:[#allocation2 + $0x50] sm:$0xff] }
   0xa   :  { %v1303_v11 = vld [vmem:[#allocation2 + $0x58] sm:$0xff]  ;;  %1056 = vmatpush.msk.msra.mxu0 %vm72_vm0, %v28_v8  ;;  %1059 = vmatpush.msk.msra.mxu1 %vm72_vm0, %v29_v9  ;;  %v58_v12 = vld [vmem:[%s1567_s0] sm:$0xff]  ;;  %v1312_v14 = vld [vmem:[#allocation2 + $0x48] sm:$0xff]  ;;  %vm127_vm10 = vcmp.lt.s32.totalorder %v126_v61, 32 }
   0xb   :  { %144 = vmatpush.msra.mxu2 %v1289_v4  ;;  %164 = vmatpush.msra.mxu3 %v1291_v5  ;;  %v1310_v13 = vld [vmem:[#allocation2 + $0x40] sm:$0xff]  ;;  %v1318_v15 = vld [vmem:[#allocation2 + $0x30] sm:$0xff]  ;;  %v1320_v16 = vld [vmem:[#allocation2 + $0x38] sm:$0xff]  ;;  %v1062_v62 = vsel %vm127_vm10, 1.0, %v1258_v19 }
   0xc   :  { %1057 = vmatmul.msk.f32.vlgmr.msra.gmra.mxu0 %vm65_vm1, %v58_v12  ;;  %1060 = vmatmul.msk.f32.vlgmr.msra.gmra.mxu1 %vm65_vm1, %v58_v12  ;;  %v1326_v17 = vld [vmem:[#allocation2 + $0x20] sm:$0xff]  ;;  %v1328_v18 = vld [vmem:[#allocation2 + $0x28] sm:$0xff]  ;;  %v31_v20 = vld [vmem:[#allocation2 + $0x10] ss:$8 sm:$0x3] }
   0xd   :  { %145 = vmatpush.msra.mxu2 %v1295_v6  ;;  %165 = vmatpush.msra.mxu3 %v1297_v7  ;;  %v1398_v21 = vperm.slane %v31_v20, 0  ;;  %v1400_v22 = vperm.slane %v31_v20, 1  ;;  %v59_v63 = vld [vmem:[%s1567_s0 + $0x8] sm:$0xff]  ;;  %s1260_s0 = smov [#allocation5]  }
   0xe   :  { %268 = vmatpush.msrb.mxu1 %v1281_v1  ;;  %248 = vmatpush.msrb.mxu0 %v1279_v0  ;;  %s1044_s20 = sshll.u32 %s1260_s0, 4  ;;  %s1045_s20 = int_to_ptr.vmem [resolvable:$true] %s1044_s20 }
   0xf   :  { %146 = vmatpush.msra.mxu2 %v1301_v10  ;;  %166 = vmatpush.msra.mxu3 %v1303_v11 }
  0x10   :  { %269 = vmatpush.msrb.mxu1 %v1287_v3  ;;  %249 = vmatpush.msrb.mxu0 %v1283_v2 }
  0x11   :  { %147 = vmatpush.msra.mxu2 %v1310_v13  ;;  %167 = vmatpush.msra.mxu3 %v1312_v14 }
  0x12   :  { %270 = vmatpush.msrb.mxu1 %v1291_v5  ;;  %250 = vmatpush.msrb.mxu0 %v1289_v4 }
  0x13   :  { %148 = vmatpush.msra.mxu2 %v1318_v15  ;;  %168 = vmatpush.msra.mxu3 %v1320_v16 }
  0x14   :  { %271 = vmatpush.msrb.mxu1 %v1297_v7  ;;  %251 = vmatpush.msrb.mxu0 %v1295_v6 }
  0x15   :  { %149 = vmatpush.msra.mxu2 %v1326_v17  ;;  %169 = vmatpush.msra.mxu3 %v1328_v18 }
  0x16   :  { %150 = vmatmul.f32.vlgmr.msra.gmra.mxu2 %v1258_v19  ;;  %170 = vmatmul.f32.vlgmr.msra.gmra.mxu3 %v1258_v19 }
  0x17   :  { %346 = vmatpush.msrb.mxu2 %v1279_v0  ;;  %366 = vmatpush.msrb.mxu3 %v1281_v1 }
  0x18   :  { %272 = vmatpush.msrb.mxu1 %v1303_v11  ;;  %252 = vmatpush.msrb.mxu0 %v1301_v10 }
  0x19   :  { %347 = vmatpush.msrb.mxu2 %v1283_v2  ;;  %367 = vmatpush.msrb.mxu3 %v1287_v3 }
  0x1a   :  { %273 = vmatpush.msrb.mxu1 %v1312_v14  ;;  %253 = vmatpush.msrb.mxu0 %v1310_v13 }
  0x1b   :  { %348 = vmatpush.msrb.mxu2 %v1289_v4  ;;  %368 = vmatpush.msrb.mxu3 %v1291_v5 }
  0x1c   :  { %274 = vmatpush.msrb.mxu1 %v1320_v16  ;;  %254 = vmatpush.msrb.mxu0 %v1318_v15 }
  0x1d   :  { %349 = vmatpush.msrb.mxu2 %v1295_v6  ;;  %369 = vmatpush.msrb.mxu3 %v1297_v7 }
  0x1e   :  { %275 = vmatpush.msrb.mxu1 %v1328_v18  ;;  %255 = vmatpush.msrb.mxu0 %v1326_v17 }
  0x1f   :  { %350 = vmatpush.msrb.mxu2 %v1301_v10  ;;  %370 = vmatpush.msrb.mxu3 %v1303_v11 }
  0x20   :  { %444 = vmatpush.msra.mxu0 %v1279_v0  ;;  %464 = vmatpush.msra.mxu1 %v1281_v1 }
  0x21   :  { %351 = vmatpush.msrb.mxu2 %v1310_v13  ;;  %371 = vmatpush.msrb.mxu3 %v1312_v14 }
  0x22   :  { %445 = vmatpush.msra.mxu0 %v1283_v2  ;;  %465 = vmatpush.msra.mxu1 %v1287_v3 }
  0x23   :  { %352 = vmatpush.msrb.mxu2 %v1318_v15  ;;  %372 = vmatpush.msrb.mxu3 %v1320_v16 }
  0x24   :  { %446 = vmatpush.msra.mxu0 %v1289_v4  ;;  %466 = vmatpush.msra.mxu1 %v1291_v5 }
  0x25   :  { %353 = vmatpush.msrb.mxu2 %v1326_v17  ;;  %373 = vmatpush.msrb.mxu3 %v1328_v18 }
  0x26   :  { %447 = vmatpush.msra.mxu0 %v1295_v6  ;;  %467 = vmatpush.msra.mxu1 %v1297_v7 }
  0x27   :  { %538 = vmatpush.msra.mxu2 %v1279_v0  ;;  %558 = vmatpush.msra.mxu3 %v1281_v1 }
  0x28   :  { %448 = vmatpush.msra.mxu0 %v1301_v10  ;;  %468 = vmatpush.msra.mxu1 %v1303_v11 }
  0x29   :  { %539 = vmatpush.msra.mxu2 %v1283_v2  ;;  %559 = vmatpush.msra.mxu3 %v1287_v3 }
  0x2a   :  { %449 = vmatpush.msra.mxu0 %v1310_v13  ;;  %469 = vmatpush.msra.mxu1 %v1312_v14 }
  0x2b   :  { %540 = vmatpush.msra.mxu2 %v1289_v4  ;;  %560 = vmatpush.msra.mxu3 %v1291_v5 }
  0x2c   :  { %450 = vmatpush.msra.mxu0 %v1318_v15  ;;  %470 = vmatpush.msra.mxu1 %v1320_v16 }
  0x2d   :  { %541 = vmatpush.msra.mxu2 %v1295_v6  ;;  %561 = vmatpush.msra.mxu3 %v1297_v7 }
  0x2e   :  { %451 = vmatpush.msra.mxu0 %v1326_v17  ;;  %471 = vmatpush.msra.mxu1 %v1328_v18 }
  0x2f   :  { %542 = vmatpush.msra.mxu2 %v1301_v10  ;;  %562 = vmatpush.msra.mxu3 %v1303_v11 }
  0x30   :  { %1058 = vmatmul.msk.f32.gmra.mxu0 %vm65_vm1, %v59_v63  ;;  %1061 = vmatmul.msk.f32.gmra.mxu1 %vm65_vm1, %v59_v63 }
  0x31   :  { %543 = vmatpush.msra.mxu2 %v1310_v13  ;;  %563 = vmatpush.msra.mxu3 %v1312_v14 }
  0x33   :  { %544 = vmatpush.msra.mxu2 %v1318_v15  ;;  %564 = vmatpush.msra.mxu3 %v1320_v16 }
  0x35   :  { %545 = vmatpush.msra.mxu2 %v1326_v17  ;;  %565 = vmatpush.msra.mxu3 %v1328_v18 }
  0x89   :  { %v96_v23 = vpop.f32.mrf.mxu0  ;;  %v119_v24 = vpop.f32.mrf.mxu1 }
  0x8a   :  { %v1403_v25 = vadd.f32 %v96_v23, %v1398_v21  ;;  %v1406_v26 = vadd.f32 %v119_v24, %v1400_v22 }
  0x99   :  { %v151_v27 = vpop.f32.mrf.mxu2  ;;  %v171_v28 = vpop.f32.mrf.mxu3 }
  0x9a   :  { %v152_v29 = vadd.f32 %v151_v27, %v1403_v25  ;;  %v172_v30 = vadd.f32 %v171_v28, %v1406_v26 }
  0x9c   :  { %v1063_v31 = vmul.f32 -1.442695, %v152_v29  ;;  %v1064_v32 = vmul.f32 -1.442695, %v172_v30  ;;  %v234_v30 = vrot.slane %v1403_v25, 2 }
  0x9e   :  { %1113 = vpow2.f32 %v1063_v31  ;;  %v235_v31 = vrot.slane %v1406_v26, 2 }
  0x9f   :  { %1115 = vpow2.f32 %v1064_v32 }
  0xa4   :  { %v1114_v33 = vpop.eup %1113 }
  0xa5   :  { %v1116_v34 = vpop.eup %1115  ;;  %v180_v35 = vadd.f32 1.0, %v1114_v33 }
  0xa6   :  { %v181_v36 = vadd.f32 1.0, %v1116_v34 }
  0xa7   :  { %1117 = vrcp.f32 %v180_v35  ;;  %v193_v49 = vand.u32 2147483648, %v180_v35  ;;  %vm187_vm6 = vweird.f32 %v180_v35  ;;  %v191_v51 = vand.u32 2147483647, %v180_v35 }
  0xa8   :  { %1119 = vrcp.f32 %v181_v36  ;;  %v208_v44 = vand.u32 2147483648, %v181_v36  ;;  %v206_v46 = vand.u32 2147483647, %v181_v36  ;;  %vm202_vm4 = vweird.f32 %v181_v36 }
  0xa9   :  { %v194_v57 = vor.u32 1.1754944e-38, %v193_v49  ;;  %vm192_vm9 = vcmp.eq.f32.partialorder %v191_v51, 8.507059e+37 }
  0xaa   :  { %v209_v50 = vor.u32 1.1754944e-38, %v208_v44  ;;  %vm207_vm7 = vcmp.eq.f32.partialorder %v206_v46, 8.507059e+37 }
  0xad   :  { %v1118_v37 = vpop.eup %1117  ;;  %v1440_v28 = vpop.f32.mrf.mxu0 }
  0xae   :  { %v1120_v38 = vpop.eup %1119  ;;  %v183_v39 = vmul.f32 %v1118_v37, %v180_v35  ;;  %vm188_vm3 = vweird.f32 %v1118_v37  ;;  %v1442_v29 = vpop.f32.mrf.mxu1 }
  0xaf   :  { %v198_v40 = vmul.f32 %v1120_v38, %v181_v36  ;;  %vm203_vm2 = vweird.f32 %v1120_v38  ;;  %vm189_vm8 = vmor %vm187_vm6, %vm188_vm3 }
  0xb0   :  { %v184_v41 = vsub.f32 1.0, %v183_v39  ;;  %vm204_vm5 = vmor %vm202_vm4, %vm203_vm2 }
  0xb1   :  { %v199_v42 = vsub.f32 1.0, %v198_v40 }
  0xb2   :  { %v185_v43 = vmul.f32 %v1118_v37, %v184_v41 }
  0xb3   :  { %v200_v45 = vmul.f32 %v1120_v38, %v199_v42 }
  0xb4   :  { %v186_v47 = vadd.f32 %v1118_v37, %v185_v43 }
  0xb5   :  { %v201_v48 = vadd.f32 %v1120_v38, %v200_v45 }
  0xb6   :  { %v190_v54 = vsel %vm189_vm8, %v1118_v37, %v186_v47 }
  0xb7   :  { %v205_v52 = vsel %vm204_vm5, %v1120_v38, %v201_v48  ;;  %v195_v59 = vsel %vm192_vm9, %v194_v57, %v190_v54 }
  0xb8   :  { %v210_v53 = vsel %vm207_vm7, %v209_v50, %v205_v52  ;;  %v214_v8 = vmul.f32 0.0, %v195_v59 }
  0xb9   :  { %v212_v55 = vmul.f32 2.0, %v210_v53 }
  0xbb   :  { %v1065_v58 = vadd.f32 -1.0, %v212_v55 }
  0xbd   :  { %v215_v60 = vmul.f32 %v1065_v58, %v195_v59 }
  0xbf   :  { %217 = vrot.lane.b32.xlu0 %v215_v60, %s1259_s17 }
  0xc7   :  { %224 = vrot.lane.b32.xlu0 %v1062_v62, %s1259_s17 }
 0x131   :  { %v218_v9 = vpop.permute.xlu0 %217 }
 0x132   :  { %v1418_v12 = vadd.f32 %v218_v9, %v214_v8 }
 0x134   :  { %1121 = vtanh.f32 %v1418_v12 }
 0x139   :  { %v225_v24 = vpop.permute.xlu0 %224 }
 0x13a   :  { %v1122_v20 = vpop.eup %1121  ;;  %v228_v57 = vmul.f32 %v225_v24, %v1418_v12 }
 0x13b   :  { %v222_v23 = vmul.f32 %v1122_v20, %v210_v53 }
 0x13d   :  { %v227_v19 = vmul.f32 %v225_v24, %v222_v23 }
 0x13f   :  { %230 = vrot.lane.b32.xlu1 %v227_v19, %s1259_s17 }
 0x1b1   :  { %v231_v27 = vpop.permute.xlu1 %230 }
 0x1b2   :  { %1066 = vmatmul.msk.f32.vlgmr.msrb.gmra.mxu0 %vm130_vm11, %v231_v27  ;;  %1067 = vmatmul.msk.f32.vlgmr.msrb.gmra.mxu1 %vm130_vm11, %v231_v27 }
 0x1b3   :  { %638 = vmatpush.msrb.mxu0 %v1279_v0  ;;  %658 = vmatpush.msrb.mxu1 %v1281_v1 }
 0x1b5   :  { %639 = vmatpush.msrb.mxu0 %v1283_v2  ;;  %659 = vmatpush.msrb.mxu1 %v1287_v3 }
 0x1b7   :  { %640 = vmatpush.msrb.mxu0 %v1289_v4  ;;  %660 = vmatpush.msrb.mxu1 %v1291_v5 }
 0x1b9   :  { %641 = vmatpush.msrb.mxu0 %v1295_v6  ;;  %661 = vmatpush.msrb.mxu1 %v1297_v7 }
 0x1bb   :  { %642 = vmatpush.msrb.mxu0 %v1301_v10  ;;  %662 = vmatpush.msrb.mxu1 %v1303_v11 }
 0x1bd   :  { %643 = vmatpush.msrb.mxu0 %v1310_v13  ;;  %663 = vmatpush.msrb.mxu1 %v1312_v14 }
 0x1bf   :  { %644 = vmatpush.msrb.mxu0 %v1318_v15  ;;  %664 = vmatpush.msrb.mxu1 %v1320_v16 }
 0x1c1   :  { %645 = vmatpush.msrb.mxu0 %v1326_v17  ;;  %665 = vmatpush.msrb.mxu1 %v1328_v18 }
 0x22f   :  { %v257_v32 = vpop.f32.mrf.mxu0  ;;  %v277_v33 = vpop.f32.mrf.mxu1 }
 0x230   :  { %v258_v34 = vadd.f32 %v257_v32, %v234_v30  ;;  %v278_v35 = vadd.f32 %v277_v33, %v235_v31  ;;  %v332_v30 = vrot.slane %v1403_v25, 4  ;;  %v333_v31 = vrot.slane %v1406_v26, 4 }
 0x232   :  { %v1068_v36 = vmul.f32 -1.442695, %v258_v34  ;;  %v1069_v37 = vmul.f32 -1.442695, %v278_v35 }
 0x234   :  { %1123 = vpow2.f32 %v1068_v36 }
 0x235   :  { %1125 = vpow2.f32 %v1069_v37 }
 0x23a   :  { %v1124_v38 = vpop.eup %1123 }
 0x23b   :  { %v1126_v39 = vpop.eup %1125  ;;  %v286_v40 = vadd.f32 1.0, %v1124_v38 }
 0x23c   :  { %v287_v41 = vadd.f32 1.0, %v1126_v39 }
 0x23d   :  { %1127 = vrcp.f32 %v286_v40  ;;  %v299_v48 = vand.u32 2147483648, %v286_v40  ;;  %v297_v50 = vand.u32 2147483647, %v286_v40  ;;  %vm293_vm14 = vweird.f32 %v286_v40 }
 0x23e   :  { %1129 = vrcp.f32 %v287_v41  ;;  %v314_v51 = vand.u32 2147483648, %v287_v41  ;;  %v312_v53 = vand.u32 2147483647, %v287_v41  ;;  %vm308_vm0 = vweird.f32 %v287_v41 }
 0x23f   :  { %v300_v55 = vor.u32 1.1754944e-38, %v299_v48  ;;  %vm298_vm1 = vcmp.eq.f32.partialorder %v297_v50, 8.507059e+37 }
 0x240   :  { %v315_v59 = vor.u32 1.1754944e-38, %v314_v51  ;;  %vm313_vm3 = vcmp.eq.f32.partialorder %v312_v53, 8.507059e+37 }
 0x243   :  { %v1128_v42 = vpop.eup %1127 }
 0x244   :  { %v1130_v43 = vpop.eup %1129  ;;  %v289_v44 = vmul.f32 %v1128_v42, %v286_v40  ;;  %vm294_vm12 = vweird.f32 %v1128_v42 }
 0x245   :  { %v304_v45 = vmul.f32 %v1130_v43, %v287_v41  ;;  %vm309_vm13 = vweird.f32 %v1130_v43  ;;  %vm295_vm15 = vmor %vm293_vm14, %vm294_vm12 }
 0x246   :  { %v290_v46 = vsub.f32 1.0, %v289_v44  ;;  %vm310_vm2 = vmor %vm308_vm0, %vm309_vm13 }
 0x247   :  { %v305_v47 = vsub.f32 1.0, %v304_v45 }
 0x248   :  { %v291_v49 = vmul.f32 %v1128_v42, %v290_v46 }
 0x249   :  { %v306_v52 = vmul.f32 %v1130_v43, %v305_v47 }
 0x24a   :  { %v292_v54 = vadd.f32 %v1128_v42, %v291_v49 }
 0x24b   :  { %v307_v56 = vadd.f32 %v1130_v43, %v306_v52 }
 0x24c   :  { %v296_v58 = vsel %vm295_vm15, %v1128_v42, %v292_v54 }
 0x24d   :  { %v301_v60 = vsel %vm298_vm1, %v300_v55, %v296_v58  ;;  %v311_v61 = vsel %vm310_vm2, %v1130_v43, %v307_v56 }
 0x24e   :  { %v316_v62 = vsel %vm313_vm3, %v315_v59, %v311_v61  ;;  %v320_v63 = vmul.f32 %v301_v60, %v228_v57 }
 0x24f   :  { %v318_v8 = vmul.f32 2.0, %v316_v62 }
 0x251   :  { %v1070_v9 = vadd.f32 -1.0, %v318_v8 }
 0x253   :  { %v321_v20 = vmul.f32 %v1070_v9, %v301_v60 }
 0x255   :  { %323 = vrot.lane.b32.xlu1 %v321_v20, %s1259_s17 }
 0x2c7   :  { %v324_v23 = vpop.permute.xlu1 %323 }
 0x2c8   :  { %v1448_v19 = vadd.f32 %v324_v23, %v320_v63 }
 0x2ca   :  { %1131 = vtanh.f32 %v1448_v19 }
 0x2d0   :  { %v1132_v12 = vpop.eup %1131 }
 0x2d1   :  { %v328_v24 = vmul.f32 %v1132_v12, %v316_v62 }
 0x2d3   :  { %330 = vrot.lane.b32.xlu2 %v328_v24, %s1259_s17 }
 0x32d   :  { %v331_v27 = vpop.permute.xlu2 %330 }
 0x32e   :  { %1071 = vmatmul.msk.f32.vlgmr.msrb.gmra.mxu2 %vm130_vm11, %v331_v27  ;;  %1072 = vmatmul.msk.f32.vlgmr.msrb.gmra.mxu3 %vm130_vm11, %v331_v27 }
 0x32f   :  { %736 = vmatpush.msrb.mxu2 %v1279_v0  ;;  %756 = vmatpush.msrb.mxu3 %v1281_v1 }
 0x331   :  { %737 = vmatpush.msrb.mxu2 %v1283_v2  ;;  %757 = vmatpush.msrb.mxu3 %v1287_v3 }
 0x333   :  { %738 = vmatpush.msrb.mxu2 %v1289_v4  ;;  %758 = vmatpush.msrb.mxu3 %v1291_v5 }
 0x335   :  { %739 = vmatpush.msrb.mxu2 %v1295_v6  ;;  %759 = vmatpush.msrb.mxu3 %v1297_v7 }
 0x337   :  { %740 = vmatpush.msrb.mxu2 %v1301_v10  ;;  %760 = vmatpush.msrb.mxu3 %v1303_v11 }
 0x339   :  { %741 = vmatpush.msrb.mxu2 %v1310_v13  ;;  %761 = vmatpush.msrb.mxu3 %v1312_v14 }
 0x33b   :  { %742 = vmatpush.msrb.mxu2 %v1318_v15  ;;  %762 = vmatpush.msrb.mxu3 %v1320_v16 }
 0x33d   :  { %743 = vmatpush.msrb.mxu2 %v1326_v17  ;;  %763 = vmatpush.msrb.mxu3 %v1328_v18 }
 0x3b1   :  { %v355_v32 = vpop.f32.mrf.mxu2  ;;  %v375_v33 = vpop.f32.mrf.mxu3 }
 0x3b2   :  { %v356_v34 = vadd.f32 %v355_v32, %v332_v30  ;;  %v376_v35 = vadd.f32 %v375_v33, %v333_v31  ;;  %v431_v30 = vrot.slane %v1406_v26, 6 }
 0x3b4   :  { %v1073_v36 = vmul.f32 -1.442695, %v356_v34  ;;  %v1074_v37 = vmul.f32 -1.442695, %v376_v35 }
 0x3b6   :  { %1133 = vpow2.f32 %v1073_v36 }
 0x3b7   :  { %1135 = vpow2.f32 %v1074_v37 }
 0x3bc   :  { %v1134_v38 = vpop.eup %1133 }
 0x3bd   :  { %v1136_v39 = vpop.eup %1135  ;;  %v384_v40 = vadd.f32 1.0, %v1134_v38 }
 0x3be   :  { %v385_v41 = vadd.f32 1.0, %v1136_v39 }
 0x3bf   :  { %1137 = vrcp.f32 %v384_v40  ;;  %v397_v54 = vand.u32 2147483648, %v384_v40  ;;  %vm391_vm8 = vweird.f32 %v384_v40  ;;  %v395_v56 = vand.u32 2147483647, %v384_v40 }
 0x3c0   :  { %1139 = vrcp.f32 %v385_v41  ;;  %v412_v49 = vand.u32 2147483648, %v385_v41  ;;  %v410_v51 = vand.u32 2147483647, %v385_v41  ;;  %vm406_vm6 = vweird.f32 %v385_v41 }
 0x3c1   :  { %v398_v61 = vor.u32 1.1754944e-38, %v397_v54  ;;  %vm396_vm12 = vcmp.eq.f32.partialorder %v395_v56, 8.507059e+37 }
 0x3c2   :  { %v413_v55 = vor.u32 1.1754944e-38, %v412_v49  ;;  %vm411_vm9 = vcmp.eq.f32.partialorder %v410_v51, 8.507059e+37 }
 0x3c5   :  { %v1138_v42 = vpop.eup %1137 }
 0x3c6   :  { %v1140_v43 = vpop.eup %1139  ;;  %v387_v44 = vmul.f32 %v1138_v42, %v384_v40  ;;  %vm392_vm5 = vweird.f32 %v1138_v42 }
 0x3c7   :  { %v402_v45 = vmul.f32 %v1140_v43, %v385_v41  ;;  %vm407_vm4 = vweird.f32 %v1140_v43  ;;  %vm393_vm10 = vmor %vm391_vm8, %vm392_vm5 }
 0x3c8   :  { %v388_v46 = vsub.f32 1.0, %v387_v44  ;;  %vm408_vm7 = vmor %vm406_vm6, %vm407_vm4 }
 0x3c9   :  { %v403_v47 = vsub.f32 1.0, %v402_v45 }
 0x3ca   :  { %v389_v48 = vmul.f32 %v1138_v42, %v388_v46 }
 0x3cb   :  { %v404_v50 = vmul.f32 %v1140_v43, %v403_v47 }
 0x3cc   :  { %v390_v52 = vadd.f32 %v1138_v42, %v389_v48 }
 0x3cd   :  { %v405_v53 = vadd.f32 %v1140_v43, %v404_v50 }
 0x3ce   :  { %v394_v59 = vsel %vm393_vm10, %v1138_v42, %v390_v52 }
 0x3cf   :  { %v409_v57 = vsel %vm408_vm7, %v1140_v43, %v405_v53  ;;  %v399_v63 = vsel %vm396_vm12, %v398_v61, %v394_v59 }
 0x3d0   :  { %v414_v58 = vsel %vm411_vm9, %v413_v55, %v409_v57  ;;  %v418_v9 = vmul.f32 %v399_v63, %v1448_v19  ;;  %v430_v19 = vrot.slane %v1403_v25, 6 }
 0x3d1   :  { %v416_v60 = vmul.f32 2.0, %v414_v58 }
 0x3d3   :  { %v1075_v62 = vadd.f32 -1.0, %v416_v60 }
 0x3d5   :  { %v419_v8 = vmul.f32 %v1075_v62, %v399_v63 }
 0x3d7   :  { %421 = vrot.lane.b32.xlu2 %v419_v8, %s1259_s17 }
 0x431   :  { %v422_v20 = vpop.permute.xlu2 %421 }
 0x432   :  { %v1474_v23 = vadd.f32 %v422_v20, %v418_v9 }
 0x434   :  { %1141 = vtanh.f32 %v1474_v23 }
 0x43a   :  { %v1142_v12 = vpop.eup %1141 }
 0x43b   :  { %v426_v24 = vmul.f32 %v1142_v12, %v414_v58 }
 0x43d   :  { %428 = vrot.lane.b32.xlu0 %v426_v24, %s1259_s17 }
 0x4af   :  { %v429_v27 = vpop.permute.xlu0 %428 }
 0x4b0   :  { %1076 = vmatmul.msk.f32.vlgmr.msra.gmra.mxu0 %vm130_vm11, %v429_v27  ;;  %1077 = vmatmul.msk.f32.vlgmr.msra.gmra.mxu1 %vm130_vm11, %v429_v27 }
 0x4b1   :  { %834 = vmatpush.msra.mxu0 %v1279_v0  ;;  %854 = vmatpush.msra.mxu1 %v1281_v1 }
 0x4b3   :  { %835 = vmatpush.msra.mxu0 %v1283_v2  ;;  %855 = vmatpush.msra.mxu1 %v1287_v3 }
 0x4b5   :  { %836 = vmatpush.msra.mxu0 %v1289_v4  ;;  %856 = vmatpush.msra.mxu1 %v1291_v5 }
 0x4b7   :  { %837 = vmatpush.msra.mxu0 %v1295_v6  ;;  %857 = vmatpush.msra.mxu1 %v1297_v7 }
 0x4b9   :  { %838 = vmatpush.msra.mxu0 %v1301_v10  ;;  %858 = vmatpush.msra.mxu1 %v1303_v11 }
 0x4bb   :  { %839 = vmatpush.msra.mxu0 %v1310_v13  ;;  %859 = vmatpush.msra.mxu1 %v1312_v14 }
 0x4bd   :  { %840 = vmatpush.msra.mxu0 %v1318_v15  ;;  %860 = vmatpush.msra.mxu1 %v1320_v16 }
 0x4bf   :  { %841 = vmatpush.msra.mxu0 %v1326_v17  ;;  %861 = vmatpush.msra.mxu1 %v1328_v18 }
 0x52d   :  { %v453_v31 = vpop.f32.mrf.mxu0  ;;  %v473_v32 = vpop.f32.mrf.mxu1 }
 0x52e   :  { %v454_v33 = vadd.f32 %v453_v31, %v430_v19  ;;  %v474_v34 = vadd.f32 %v473_v32, %v431_v30 }
 0x530   :  { %v1078_v35 = vmul.f32 -1.442695, %v454_v33  ;;  %v1079_v36 = vmul.f32 -1.442695, %v474_v34 }
 0x532   :  { %1143 = vpow2.f32 %v1078_v35 }
 0x533   :  { %1145 = vpow2.f32 %v1079_v36 }
 0x538   :  { %v1144_v37 = vpop.eup %1143 }
 0x539   :  { %v1146_v38 = vpop.eup %1145  ;;  %v482_v39 = vadd.f32 1.0, %v1144_v37 }
 0x53a   :  { %v483_v40 = vadd.f32 1.0, %v1146_v38 }
 0x53b   :  { %1147 = vrcp.f32 %v482_v39  ;;  %v495_v51 = vand.u32 2147483648, %v482_v39  ;;  %vm489_vm1 = vweird.f32 %v482_v39  ;;  %v493_v53 = vand.u32 2147483647, %v482_v39 }
 0x53c   :  { %1149 = vrcp.f32 %v483_v40  ;;  %v510_v46 = vand.u32 2147483648, %v483_v40  ;;  %v508_v48 = vand.u32 2147483647, %v483_v40  ;;  %vm504_vm15 = vweird.f32 %v483_v40 }
 0x53d   :  { %v496_v58 = vor.u32 1.1754944e-38, %v495_v51  ;;  %vm494_vm4 = vcmp.eq.f32.partialorder %v493_v53, 8.507059e+37 }
 0x53e   :  { %v511_v52 = vor.u32 1.1754944e-38, %v510_v46  ;;  %vm509_vm2 = vcmp.eq.f32.partialorder %v508_v48, 8.507059e+37 }
 0x541   :  { %v1148_v41 = vpop.eup %1147 }
 0x542   :  { %v1150_v42 = vpop.eup %1149  ;;  %v485_v43 = vmul.f32 %v1148_v41, %v482_v39  ;;  %vm490_vm14 = vweird.f32 %v1148_v41 }
 0x543   :  { %v500_v25 = vmul.f32 %v1150_v42, %v483_v40  ;;  %vm505_vm13 = vweird.f32 %v1150_v42  ;;  %vm491_vm3 = vmor %vm489_vm1, %vm490_vm14 }
 0x544   :  { %v486_v44 = vsub.f32 1.0, %v485_v43  ;;  %vm506_vm0 = vmor %vm504_vm15, %vm505_vm13 }
 0x545   :  { %v501_v26 = vsub.f32 1.0, %v500_v25 }
 0x546   :  { %v487_v45 = vmul.f32 %v1148_v41, %v486_v44 }
 0x547   :  { %v502_v47 = vmul.f32 %v1150_v42, %v501_v26 }
 0x548   :  { %v488_v49 = vadd.f32 %v1148_v41, %v487_v45 }
 0x549   :  { %v503_v50 = vadd.f32 %v1150_v42, %v502_v47 }
 0x54a   :  { %v492_v56 = vsel %vm491_vm3, %v1148_v41, %v488_v49 }
 0x54b   :  { %v507_v54 = vsel %vm506_vm0, %v1150_v42, %v503_v50  ;;  %v497_v60 = vsel %vm494_vm4, %v496_v58, %v492_v56 }
 0x54c   :  { %v512_v55 = vsel %vm509_vm2, %v511_v52, %v507_v54  ;;  %v516_v62 = vmul.f32 %v497_v60, %v1474_v23 }
 0x54d   :  { %v514_v57 = vmul.f32 2.0, %v512_v55 }
 0x54f   :  { %v1080_v59 = vadd.f32 -1.0, %v514_v57 }
 0x551   :  { %v517_v61 = vmul.f32 %v1080_v59, %v497_v60 }
 0x553   :  { %519 = vrot.lane.b32.xlu1 %v517_v61, %s1259_s17 }
 0x5c5   :  { %v520_v63 = vpop.permute.xlu1 %519 }
 0x5c6   :  { %v1500_v8 = vadd.f32 %v520_v63, %v516_v62 }
 0x5c8   :  { %1151 = vtanh.f32 %v1500_v8 }
 0x5ce   :  { %v1152_v9 = vpop.eup %1151 }
 0x5cf   :  { %v524_v20 = vmul.f32 %v1152_v9, %v512_v55 }
 0x5d1   :  { %526 = vrot.lane.b32.xlu2 %v524_v20, %s1259_s17 }
 0x62b   :  { %v527_v12 = vpop.permute.xlu2 %526 }
 0x62c   :  { %1081 = vmatmul.msk.f32.vlgmr.msra.gmra.mxu2 %vm130_vm11, %v527_v12  ;;  %1082 = vmatmul.msk.f32.vlgmr.msra.gmra.mxu3 %vm130_vm11, %v527_v12 }
 0x62d   :  { %928 = vmatpush.msra.mxu2 %v1279_v0  ;;  %948 = vmatpush.msra.mxu3 %v1281_v1  ;;  %v1524_v0 = vadd.f32 %v1440_v28, %v1398_v21  ;;  %v1528_v1 = vadd.f32 %v1442_v29, %v1400_v22 }
 0x62f   :  { %929 = vmatpush.msra.mxu2 %v1283_v2  ;;  %949 = vmatpush.msra.mxu3 %v1287_v3  ;;  %v624_v47 = vrot.slane %v1524_v0, 2  ;;  %v625_v48 = vrot.slane %v1528_v1, 2 }
 0x631   :  { %930 = vmatpush.msra.mxu2 %v1289_v4  ;;  %950 = vmatpush.msra.mxu3 %v1291_v5 }
 0x633   :  { %931 = vmatpush.msra.mxu2 %v1295_v6  ;;  %951 = vmatpush.msra.mxu3 %v1297_v7 }
 0x635   :  { %932 = vmatpush.msra.mxu2 %v1301_v10  ;;  %952 = vmatpush.msra.mxu3 %v1303_v11 }
 0x637   :  { %933 = vmatpush.msra.mxu2 %v1310_v13  ;;  %953 = vmatpush.msra.mxu3 %v1312_v14 }
 0x639   :  { %934 = vmatpush.msra.mxu2 %v1318_v15  ;;  %954 = vmatpush.msra.mxu3 %v1320_v16 }
 0x63b   :  { %935 = vmatpush.msra.mxu2 %v1326_v17  ;;  %955 = vmatpush.msra.mxu3 %v1328_v18 }
 0x6af   :  { %v547_v2 = vpop.f32.mrf.mxu2  ;;  %v567_v3 = vpop.f32.mrf.mxu3 }
 0x6b0   :  { %v548_v4 = vadd.f32 %v547_v2, %v1524_v0  ;;  %v568_v5 = vadd.f32 %v567_v3, %v1528_v1 }
 0x6b2   :  { %v1083_v6 = vmul.f32 -1.442695, %v548_v4  ;;  %v1084_v7 = vmul.f32 -1.442695, %v568_v5 }
 0x6b4   :  { %1153 = vpow2.f32 %v1083_v6 }
 0x6b5   :  { %1155 = vpow2.f32 %v1084_v7 }
 0x6ba   :  { %v1154_v10 = vpop.eup %1153 }
 0x6bb   :  { %v1156_v11 = vpop.eup %1155  ;;  %v576_v13 = vadd.f32 1.0, %v1154_v10 }
 0x6bc   :  { %v577_v14 = vadd.f32 1.0, %v1156_v11 }
 0x6bd   :  { %1157 = vrcp.f32 %v576_v13  ;;  %v589_v32 = vand.u32 2147483648, %v576_v13  ;;  %vm583_vm9 = vweird.f32 %v576_v13  ;;  %v587_v34 = vand.u32 2147483647, %v576_v13 }
 0x6be   :  { %1159 = vrcp.f32 %v577_v14  ;;  %v604_v24 = vand.u32 2147483648, %v577_v14  ;;  %v602_v19 = vand.u32 2147483647, %v577_v14  ;;  %vm598_vm7 = vweird.f32 %v577_v14 }
 0x6bf   :  { %v590_v39 = vor.u32 1.1754944e-38, %v589_v32  ;;  %vm588_vm13 = vcmp.eq.f32.partialorder %v587_v34, 8.507059e+37 }
 0x6c0   :  { %v605_v33 = vor.u32 1.1754944e-38, %v604_v24  ;;  %vm603_vm10 = vcmp.eq.f32.partialorder %v602_v19, 8.507059e+37 }
 0x6c3   :  { %v1158_v15 = vpop.eup %1157 }
 0x6c4   :  { %v1160_v16 = vpop.eup %1159  ;;  %v579_v17 = vmul.f32 %v1158_v15, %v576_v13  ;;  %vm584_vm6 = vweird.f32 %v1158_v15 }
 0x6c5   :  { %v594_v18 = vmul.f32 %v1160_v16, %v577_v14  ;;  %vm599_vm5 = vweird.f32 %v1160_v16  ;;  %vm585_vm12 = vmor %vm583_vm9, %vm584_vm6 }
 0x6c6   :  { %v580_v28 = vsub.f32 1.0, %v579_v17  ;;  %vm600_vm8 = vmor %vm598_vm7, %vm599_vm5 }
 0x6c7   :  { %v595_v29 = vsub.f32 1.0, %v594_v18 }
 0x6c8   :  { %v581_v23 = vmul.f32 %v1158_v15, %v580_v28 }
 0x6c9   :  { %v596_v27 = vmul.f32 %v1160_v16, %v595_v29 }
 0x6ca   :  { %v582_v30 = vadd.f32 %v1158_v15, %v581_v23 }
 0x6cb   :  { %v597_v31 = vadd.f32 %v1160_v16, %v596_v27 }
 0x6cc   :  { %v586_v37 = vsel %vm585_vm12, %v1158_v15, %v582_v30  ;;  %v722_v30 = vrot.slane %v1524_v0, 4 }
 0x6cd   :  { %v601_v35 = vsel %vm600_vm8, %v1160_v16, %v597_v31  ;;  %v591_v41 = vsel %vm588_vm13, %v590_v39, %v586_v37  ;;  %v723_v31 = vrot.slane %v1528_v1, 4 }
 0x6ce   :  { %v606_v36 = vsel %vm603_vm10, %v605_v33, %v601_v35  ;;  %v610_v43 = vmul.f32 %v591_v41, %v1500_v8 }
 0x6cf   :  { %v608_v38 = vmul.f32 2.0, %v606_v36 }
 0x6d1   :  { %v1085_v40 = vadd.f32 -1.0, %v608_v38 }
 0x6d3   :  { %v611_v42 = vmul.f32 %v1085_v40, %v591_v41 }
 0x6d5   :  { %613 = vrot.lane.b32.xlu0 %v611_v42, %s1259_s17 }
 0x747   :  { %v614_v25 = vpop.permute.xlu0 %613 }
 0x748   :  { %v616_v44 = vadd.f32 %v614_v25, %v610_v43 }
 0x74a   :  { %1161 = vtanh.f32 %v616_v44 }
 0x750   :  { %v1162_v26 = vpop.eup %1161 }
 0x751   :  { %v618_v45 = vmul.f32 %v1162_v26, %v606_v36 }
 0x753   :  { %620 = vrot.lane.b32.xlu1 %v618_v45, %s1259_s17 }
 0x7c5   :  { %v621_v46 = vpop.permute.xlu1 %620 }
 0x7c6   :  { %1086 = vmatmul.msk.f32.vlgmr.msrb.gmra.mxu0 %vm130_vm11, %v621_v46  ;;  %1087 = vmatmul.msk.f32.vlgmr.msrb.gmra.mxu1 %vm130_vm11, %v621_v46 }
 0x843   :  { %v647_v49 = vpop.f32.mrf.mxu0  ;;  %v667_v50 = vpop.f32.mrf.mxu1 }
 0x844   :  { %v648_v51 = vadd.f32 %v647_v49, %v624_v47  ;;  %v668_v52 = vadd.f32 %v667_v50, %v625_v48 }
 0x846   :  { %v1088_v53 = vmul.f32 -1.442695, %v648_v51  ;;  %v1089_v54 = vmul.f32 -1.442695, %v668_v52 }
 0x848   :  { %1163 = vpow2.f32 %v1088_v53 }
 0x849   :  { %1165 = vpow2.f32 %v1089_v54 }
 0x84e   :  { %v1164_v55 = vpop.eup %1163 }
 0x84f   :  { %v1166_v56 = vpop.eup %1165  ;;  %v676_v57 = vadd.f32 1.0, %v1164_v55 }
 0x850   :  { %v677_v58 = vadd.f32 1.0, %v1166_v56 }
 0x851   :  { %1167 = vrcp.f32 %v676_v57  ;;  %v689_v5 = vand.u32 2147483648, %v676_v57  ;;  %vm683_vm2 = vweird.f32 %v676_v57  ;;  %v687_v7 = vand.u32 2147483647, %v676_v57 }
 0x852   :  { %1169 = vrcp.f32 %v677_v58  ;;  %v704_v20 = vand.u32 2147483648, %v677_v58  ;;  %v702_v2 = vand.u32 2147483647, %v677_v58  ;;  %vm698_vm0 = vweird.f32 %v677_v58 }
 0x853   :  { %v690_v15 = vor.u32 1.1754944e-38, %v689_v5  ;;  %vm688_vm5 = vcmp.eq.f32.partialorder %v687_v7, 8.507059e+37 }
 0x854   :  { %v705_v6 = vor.u32 1.1754944e-38, %v704_v20  ;;  %vm703_vm3 = vcmp.eq.f32.partialorder %v702_v2, 8.507059e+37 }
 0x857   :  { %v1168_v59 = vpop.eup %1167 }
 0x858   :  { %v1170_v60 = vpop.eup %1169  ;;  %v679_v61 = vmul.f32 %v1168_v59, %v676_v57  ;;  %vm684_vm15 = vweird.f32 %v1168_v59 }
 0x859   :  { %v694_v62 = vmul.f32 %v1170_v60, %v677_v58  ;;  %vm699_vm14 = vweird.f32 %v1170_v60  ;;  %vm685_vm4 = vmor %vm683_vm2, %vm684_vm15 }
 0x85a   :  { %v680_v63 = vsub.f32 1.0, %v679_v61  ;;  %vm700_vm1 = vmor %vm698_vm0, %vm699_vm14 }
 0x85b   :  { %v695_v8 = vsub.f32 1.0, %v694_v62 }
 0x85c   :  { %v681_v9 = vmul.f32 %v1168_v59, %v680_v63 }
 0x85d   :  { %v696_v12 = vmul.f32 %v1170_v60, %v695_v8 }
 0x85e   :  { %v682_v3 = vadd.f32 %v1168_v59, %v681_v9 }
 0x85f   :  { %v697_v4 = vadd.f32 %v1170_v60, %v696_v12 }
 0x860   :  { %v686_v13 = vsel %vm685_vm4, %v1168_v59, %v682_v3  ;;  %v820_v3 = vrot.slane %v1524_v0, 6 }
 0x861   :  { %v701_v10 = vsel %vm700_vm1, %v1170_v60, %v697_v4  ;;  %v691_v17 = vsel %vm688_vm5, %v690_v15, %v686_v13  ;;  %v821_v4 = vrot.slane %v1528_v1, 6 }
 0x862   :  { %v706_v11 = vsel %vm703_vm3, %v705_v6, %v701_v10  ;;  %v710_v28 = vmul.f32 %v691_v17, %v616_v44 }
 0x863   :  { %v708_v14 = vmul.f32 2.0, %v706_v11 }
 0x865   :  { %v1090_v16 = vadd.f32 -1.0, %v708_v14 }
 0x867   :  { %v711_v18 = vmul.f32 %v1090_v16, %v691_v17 }
 0x869   :  { %713 = vrot.lane.b32.xlu2 %v711_v18, %s1259_s17 }
 0x8c3   :  { %v714_v29 = vpop.permute.xlu2 %713 }
 0x8c4   :  { %v716_v23 = vadd.f32 %v714_v29, %v710_v28 }
 0x8c6   :  { %1171 = vtanh.f32 %v716_v23 }
 0x8cc   :  { %v1172_v24 = vpop.eup %1171 }
 0x8cd   :  { %v718_v27 = vmul.f32 %v1172_v24, %v706_v11 }
 0x8cf   :  { %720 = vrot.lane.b32.xlu0 %v718_v27, %s1259_s17 }
 0x941   :  { %v721_v19 = vpop.permute.xlu0 %720 }
 0x942   :  { %1091 = vmatmul.msk.f32.vlgmr.msrb.gmra.mxu2 %vm130_vm11, %v721_v19  ;;  %1092 = vmatmul.msk.f32.vlgmr.msrb.gmra.mxu3 %vm130_vm11, %v721_v19 }
 0x9c5   :  { %v745_v32 = vpop.f32.mrf.mxu2  ;;  %v765_v33 = vpop.f32.mrf.mxu3 }
 0x9c6   :  { %v746_v34 = vadd.f32 %v745_v32, %v722_v30  ;;  %v766_v35 = vadd.f32 %v765_v33, %v723_v31 }
 0x9c8   :  { %v1093_v36 = vmul.f32 -1.442695, %v746_v34  ;;  %v1094_v37 = vmul.f32 -1.442695, %v766_v35 }
 0x9ca   :  { %1173 = vpow2.f32 %v1093_v36 }
 0x9cb   :  { %1175 = vpow2.f32 %v1094_v37 }
 0x9d0   :  { %v1174_v38 = vpop.eup %1173 }
 0x9d1   :  { %v1176_v39 = vpop.eup %1175  ;;  %v774_v40 = vadd.f32 1.0, %v1174_v38 }
 0x9d2   :  { %v775_v41 = vadd.f32 1.0, %v1176_v39 }
 0x9d3   :  { %1177 = vrcp.f32 %v774_v40  ;;  %v787_v52 = vand.u32 2147483648, %v774_v40  ;;  %vm781_vm10 = vweird.f32 %v774_v40  ;;  %v785_v54 = vand.u32 2147483647, %v774_v40 }
 0x9d4   :  { %1179 = vrcp.f32 %v775_v41  ;;  %v802_v47 = vand.u32 2147483648, %v775_v41  ;;  %v800_v49 = vand.u32 2147483647, %v775_v41  ;;  %vm796_vm8 = vweird.f32 %v775_v41 }
 0x9d5   :  { %v788_v59 = vor.u32 1.1754944e-38, %v787_v52  ;;  %vm786_vm14 = vcmp.eq.f32.partialorder %v785_v54, 8.507059e+37 }
 0x9d6   :  { %v803_v53 = vor.u32 1.1754944e-38, %v802_v47  ;;  %vm801_vm12 = vcmp.eq.f32.partialorder %v800_v49, 8.507059e+37 }
 0x9d9   :  { %v1178_v42 = vpop.eup %1177 }
 0x9da   :  { %v1180_v43 = vpop.eup %1179  ;;  %v777_v25 = vmul.f32 %v1178_v42, %v774_v40  ;;  %vm782_vm7 = vweird.f32 %v1178_v42 }
 0x9db   :  { %v792_v44 = vmul.f32 %v1180_v43, %v775_v41  ;;  %vm797_vm6 = vweird.f32 %v1180_v43  ;;  %vm783_vm13 = vmor %vm781_vm10, %vm782_vm7 }
 0x9dc   :  { %v778_v26 = vsub.f32 1.0, %v777_v25  ;;  %vm798_vm9 = vmor %vm796_vm8, %vm797_vm6 }
 0x9dd   :  { %v793_v45 = vsub.f32 1.0, %v792_v44 }
 0x9de   :  { %v779_v46 = vmul.f32 %v1178_v42, %v778_v26 }
 0x9df   :  { %v794_v48 = vmul.f32 %v1180_v43, %v793_v45 }
 0x9e0   :  { %v780_v50 = vadd.f32 %v1178_v42, %v779_v46 }
 0x9e1   :  { %v795_v51 = vadd.f32 %v1180_v43, %v794_v48 }
 0x9e2   :  { %v784_v57 = vsel %vm783_vm13, %v1178_v42, %v780_v50 }
 0x9e3   :  { %v799_v55 = vsel %vm798_vm9, %v1180_v43, %v795_v51  ;;  %v789_v61 = vsel %vm786_vm14, %v788_v59, %v784_v57 }
 0x9e4   :  { %v804_v56 = vsel %vm801_vm12, %v803_v53, %v799_v55  ;;  %v808_v63 = vmul.f32 %v789_v61, %v716_v23 }
 0x9e5   :  { %v806_v58 = vmul.f32 2.0, %v804_v56 }
 0x9e7   :  { %v1095_v60 = vadd.f32 -1.0, %v806_v58 }
 0x9e9   :  { %v809_v62 = vmul.f32 %v1095_v60, %v789_v61 }
 0x9eb   :  { %811 = vrot.lane.b32.xlu1 %v809_v62, %s1259_s17 }
 0xa5d   :  { %v812_v8 = vpop.permute.xlu1 %811 }
 0xa5e   :  { %v814_v9 = vadd.f32 %v812_v8, %v808_v63 }
 0xa60   :  { %1181 = vtanh.f32 %v814_v9 }
 0xa66   :  { %v1182_v20 = vpop.eup %1181 }
 0xa67   :  { %v816_v12 = vmul.f32 %v1182_v20, %v804_v56 }
 0xa69   :  { %818 = vrot.lane.b32.xlu2 %v816_v12, %s1259_s17 }
 0xac3   :  { %v819_v2 = vpop.permute.xlu2 %818 }
 0xac4   :  { %1096 = vmatmul.msk.f32.vlgmr.msra.gmra.mxu0 %vm130_vm11, %v819_v2  ;;  %1097 = vmatmul.msk.f32.vlgmr.msra.gmra.mxu1 %vm130_vm11, %v819_v2 }
 0xb41   :  { %v843_v5 = vpop.f32.mrf.mxu0  ;;  %v863_v6 = vpop.f32.mrf.mxu1 }
 0xb42   :  { %v844_v7 = vadd.f32 %v843_v5, %v820_v3  ;;  %v864_v10 = vadd.f32 %v863_v6, %v821_v4 }
 0xb44   :  { %v1098_v11 = vmul.f32 -1.442695, %v844_v7  ;;  %v1099_v13 = vmul.f32 -1.442695, %v864_v10 }
 0xb46   :  { %1183 = vpow2.f32 %v1098_v11 }
 0xb47   :  { %1185 = vpow2.f32 %v1099_v13 }
 0xb4c   :  { %v1184_v14 = vpop.eup %1183 }
 0xb4d   :  { %v1186_v15 = vpop.eup %1185  ;;  %v872_v16 = vadd.f32 1.0, %v1184_v14 }
 0xb4e   :  { %v873_v17 = vadd.f32 1.0, %v1186_v15 }
 0xb4f   :  { %1187 = vrcp.f32 %v872_v16  ;;  %v885_v33 = vand.u32 2147483648, %v872_v16  ;;  %vm879_vm3 = vweird.f32 %v872_v16  ;;  %v883_v35 = vand.u32 2147483647, %v872_v16 }
 0xb50   :  { %1189 = vrcp.f32 %v873_v17  ;;  %v900_v27 = vand.u32 2147483648, %v873_v17  ;;  %v898_v30 = vand.u32 2147483647, %v873_v17  ;;  %vm894_vm1 = vweird.f32 %v873_v17 }
 0xb51   :  { %v886_v40 = vor.u32 1.1754944e-38, %v885_v33  ;;  %vm884_vm6 = vcmp.eq.f32.partialorder %v883_v35, 8.507059e+37  ;;  %v57_v33 = vld [vmem:[#allocation2 + $0x120] ss:$8 sm:$0x3] }
 0xb52   :  { %v901_v34 = vor.u32 1.1754944e-38, %v900_v27  ;;  %vm899_vm4 = vcmp.eq.f32.partialorder %v898_v30, 8.507059e+37 }
 0xb55   :  { %v1188_v18 = vpop.eup %1187 }
 0xb56   :  { %v1190_v28 = vpop.eup %1189  ;;  %v875_v29 = vmul.f32 %v1188_v18, %v872_v16  ;;  %vm880_vm0 = vweird.f32 %v1188_v18  ;;  %v55_v16 = vld [vmem:[#allocation2 + $0x110] sm:$0xff] }
 0xb57   :  { %v890_v0 = vmul.f32 %v1190_v28, %v873_v17  ;;  %vm895_vm15 = vweird.f32 %v1190_v28  ;;  %vm881_vm5 = vmor %vm879_vm3, %vm880_vm0  ;;  %v54_v17 = vld [vmem:[#allocation2 + $0x100] sm:$0xff]  ;;  %1025 = vmatpush.msrb.mxu0 %v55_v16  ;;  %vm1037_vm0 = vcmask 58368  }
 0xb58   :  { %v876_v23 = vsub.f32 1.0, %v875_v29  ;;  %vm896_vm2 = vmor %vm894_vm1, %vm895_vm15  ;;  %v51_v29 = vld [vmem:[#allocation2 + $0xd0] sm:$0xff] }
 0xb59   :  { %v891_v1 = vsub.f32 1.0, %v890_v0  ;;  %1026 = vmatpush.msrb.mxu0 %v54_v17  ;;  %v50_v0 = vld [vmem:[#allocation2 + $0xc0] sm:$0xff] }
 0xb5a   :  { %v877_v24 = vmul.f32 %v1188_v18, %v876_v23  ;;  %v49_v23 = vld [vmem:[#allocation2 + $0xb0] sm:$0xff] }
 0xb5b   :  { %v892_v19 = vmul.f32 %v1190_v28, %v891_v1  ;;  %v48_v1 = vld [vmem:[#allocation2 + $0xa0] sm:$0xff] }
 0xb5c   :  { %v878_v31 = vadd.f32 %v1188_v18, %v877_v24 }
 0xb5d   :  { %v893_v32 = vadd.f32 %v1190_v28, %v892_v19 }
 0xb5e   :  { %v882_v38 = vsel %vm881_vm5, %v1188_v18, %v878_v31  ;;  %v53_v18 = vld [vmem:[#allocation2 + $0xf0] sm:$0xff] }
 0xb5f   :  { %v897_v36 = vsel %vm896_vm2, %v1190_v28, %v893_v32  ;;  %v887_v42 = vsel %vm884_vm6, %v886_v40, %v882_v38  ;;  %v52_v28 = vld [vmem:[#allocation2 + $0xe0] sm:$0xff]  ;;  %1027 = vmatpush.msrb.mxu0 %v53_v18 }
 0xb60   :  { %v902_v37 = vsel %vm899_vm4, %v901_v34, %v897_v36  ;;  %v906_v25 = vmul.f32 %v887_v42, %v814_v9  ;;  %v1010_v34 = vperm.slane %v57_v33, 0 }
 0xb61   :  { %v904_v39 = vmul.f32 2.0, %v902_v37  ;;  %1028 = vmatpush.msrb.mxu0 %v52_v28 }
 0xb63   :  { %v1100_v41 = vadd.f32 -1.0, %v904_v39  ;;  %1029 = vmatpush.msrb.mxu0 %v51_v29 }
 0xb65   :  { %v907_v43 = vmul.f32 %v1100_v41, %v887_v42  ;;  %1030 = vmatpush.msrb.mxu0 %v50_v0 }
 0xb67   :  { %909 = vrot.lane.b32.xlu0 %v907_v43, %s1259_s17  ;;  %1031 = vmatpush.msrb.mxu0 %v49_v23 }
 0xb69   :  { %1032 = vmatpush.msrb.mxu0 %v48_v1 }
 0xbd9   :  { %v910_v44 = vpop.permute.xlu0 %909 }
 0xbda   :  { %v1552_v26 = vadd.f32 %v910_v44, %v906_v25 }
 0xbdc   :  { %1191 = vtanh.f32 %v1552_v26 }
 0xbe2   :  { %v1192_v45 = vpop.eup %1191 }
 0xbe3   :  { %v914_v46 = vmul.f32 %v1192_v45, %v902_v37 }
 0xbe5   :  { %916 = vrot.lane.b32.xlu1 %v914_v46, %s1259_s17 }
 0xc57   :  { %v917_v47 = vpop.permute.xlu1 %916 }
 0xc58   :  { %1101 = vmatmul.msk.f32.vlgmr.msra.gmra.mxu2 %vm130_vm11, %v917_v47  ;;  %1102 = vmatmul.msk.f32.vlgmr.msra.gmra.mxu3 %vm130_vm11, %v917_v47 }
 0xcdb   :  { %v937_v48 = vpop.f32.mrf.mxu2  ;;  %v957_v49 = vpop.f32.mrf.mxu3 }
 0xcdc   :  { %v938_v50 = vadd.f32 %v937_v48, %v1398_v21  ;;  %v958_v51 = vadd.f32 %v957_v49, %v1400_v22 }
 0xcde   :  { %v1103_v52 = vmul.f32 -1.442695, %v938_v50  ;;  %v1104_v53 = vmul.f32 -1.442695, %v958_v51 }
 0xce0   :  { %1193 = vpow2.f32 %v1103_v52 }
 0xce1   :  { %1195 = vpow2.f32 %v1104_v53 }
 0xce6   :  { %v1194_v54 = vpop.eup %1193 }
 0xce7   :  { %v1196_v55 = vpop.eup %1195  ;;  %v966_v56 = vadd.f32 1.0, %v1194_v54 }
 0xce8   :  { %v967_v57 = vadd.f32 1.0, %v1196_v55 }
 0xce9   :  { %1197 = vrcp.f32 %v966_v56  ;;  %v979_v2 = vand.u32 2147483648, %v966_v56  ;;  %vm973_vm12 = vweird.f32 %v966_v56  ;;  %v977_v4 = vand.u32 2147483647, %v966_v56 }
 0xcea   :  { %1199 = vrcp.f32 %v967_v57  ;;  %v994_v21 = vand.u32 2147483648, %v967_v57  ;;  %v992_v22 = vand.u32 2147483647, %v967_v57  ;;  %vm988_vm9 = vweird.f32 %v967_v57 }
 0xceb   :  { %v980_v11 = vor.u32 1.1754944e-38, %v979_v2  ;;  %vm978_vm15 = vcmp.eq.f32.partialorder %v977_v4, 8.507059e+37 }
 0xcec   :  { %v995_v3 = vor.u32 1.1754944e-38, %v994_v21  ;;  %vm993_vm13 = vcmp.eq.f32.partialorder %v992_v22, 8.507059e+37 }
 0xcef   :  { %v1198_v58 = vpop.eup %1197 }
 0xcf0   :  { %v1200_v59 = vpop.eup %1199  ;;  %v969_v60 = vmul.f32 %v1198_v58, %v966_v56  ;;  %vm974_vm8 = vweird.f32 %v1198_v58 }
 0xcf1   :  { %v984_v61 = vmul.f32 %v1200_v59, %v967_v57  ;;  %vm989_vm7 = vweird.f32 %v1200_v59  ;;  %vm975_vm14 = vmor %vm973_vm12, %vm974_vm8 }
 0xcf2   :  { %v970_v62 = vsub.f32 1.0, %v969_v60  ;;  %vm990_vm10 = vmor %vm988_vm9, %vm989_vm7 }
 0xcf3   :  { %v985_v63 = vsub.f32 1.0, %v984_v61 }
 0xcf4   :  { %v971_v8 = vmul.f32 %v1198_v58, %v970_v62 }
 0xcf5   :  { %v986_v9 = vmul.f32 %v1200_v59, %v985_v63 }
 0xcf6   :  { %v972_v20 = vadd.f32 %v1198_v58, %v971_v8 }
 0xcf7   :  { %v987_v12 = vadd.f32 %v1200_v59, %v986_v9 }
 0xcf8   :  { %v976_v7 = vsel %vm975_vm14, %v1198_v58, %v972_v20 }
 0xcf9   :  { %v991_v5 = vsel %vm990_vm10, %v1200_v59, %v987_v12  ;;  %v981_v14 = vsel %vm978_vm15, %v980_v11, %v976_v7 }
 0xcfa   :  { %v996_v6 = vsel %vm993_vm13, %v995_v3, %v991_v5  ;;  %v1000_v24 = vmul.f32 %v981_v14, %v1552_v26 }
 0xcfb   :  { %v998_v10 = vmul.f32 2.0, %v996_v6 }
 0xcfd   :  { %v1105_v13 = vadd.f32 -1.0, %v998_v10 }
 0xcff   :  { %v1001_v15 = vmul.f32 %v1105_v13, %v981_v14 }
 0xd01   :  { %1003 = vrot.lane.b32.xlu2 %v1001_v15, %s1259_s17 }
 0xd5b   :  { %v1004_v27 = vpop.permute.xlu2 %1003 }
 0xd5c   :  { %v1006_v19 = vadd.f32 %v1004_v27, %v1000_v24 }
 0xd5e   :  { %1201 = vtanh.f32 %v1006_v19 }
 0xd64   :  { %v1202_v30 = vpop.eup %1201 }
 0xd65   :  { %v1008_v31 = vmul.f32 %v1202_v30, %v996_v6 }
 0xd67   :  { %1013 = vrot.lane.b32.xlu0 %v1008_v31, %s1259_s17 }
 0xdd9   :  { %v1014_v32 = vpop.permute.xlu0 %1013 }
 0xdda   :  { %1106 = vmatmul.msk.f32.vlgmr.msrb.gmra.mxu0 %vm130_vm11, %v1014_v32 }
 0xe57   :  { %v1034_v35 = vpop.f32.mrf.mxu0 }
 0xe58   :  { %v1035_v36 = vadd.f32 %v1034_v35, %v1010_v34 }
 0xe5a   :  { %1038 = vst.msk [vmem:[#allocation5] sm:$0x3] %vm1037_vm0, %v1035_v36 }
 0xe5b   :  { %1049 = dma.vmem_to_hbm [thread:$0]  %s1045_s20, 32, %s1047_s23, [#allocation4]  }
 0xe5c   :  { %1253 = dma.done.wait [#allocation4], 32  }
 0xe5d   :  { %1254 = vsyncadd [#allocation4], 4294967264 }
 0xe5e   :  { %1054 = vsyncpa [#allocation3], 1 }
 0xe5f   :  { %1055 = vsyncpa [#allocation4], 1 }

</bundles_post_ra>
